<compile_context>
chip_gen: v6e
topology: v6e:2x2x1
jax: 0.10.0
libtpu: 0.0.40
codegen_flags: <defaults>
</compile_context>

<pallas_src>
import functools

import jax
import jax.numpy as jnp
from jax.experimental import pallas as pl
from jax.experimental.pallas import tpu as pltpu


def _round_up(x, m):
    return ((x + m - 1) // m) * m


# ------------------------------ Pallas kernel ---------------------------------

def _conv_taps_kernel(*refs, taps, m_rows, relu, has_shortcut):
    """Fused conv-as-shifted-matmuls kernel.

    refs = (x_ref, w_ref, b_ref[, sc_ref], o_ref)
      x_ref : (1, G, L, Cin)   f32  phase-decomposed, spatially padded activation
      w_ref : (T, Cin, tn)     bf16 per-tap weight with BN scale folded in
      b_ref : (1, tn)          f32  folded BN bias
      sc_ref: (1, m_rows, tn)  f32  optional shortcut (same row layout as out)
      o_ref : (1, m_rows, tn)
    For tap t = (g, base): out[r, :] += x[g, base + r, :] @ w[t],  r < m_rows.
    """
    if has_shortcut:
        x_ref, w_ref, b_ref, sc_ref, o_ref = refs
    else:
        x_ref, w_ref, b_ref, o_ref = refs
        sc_ref = None

    acc = None
    for t, (g, base) in enumerate(taps):
        xs = x_ref[0, g, base:base + m_rows, :].astype(jnp.bfloat16)
        d = jnp.dot(xs, w_ref[t], preferred_element_type=jnp.float32)
        acc = d if acc is None else acc + d

    y = acc + b_ref[...]
    if has_shortcut:
        y = y + sc_ref[0].astype(jnp.float32)
    if relu:
        y = jnp.maximum(y, 0.0)
    o_ref[0] = y.astype(o_ref.dtype)


# ------------------------------ kernel wrapper ---------------------------------

def _conv_taps_call(x_flat, w_taps, bias, *, m_rows, taps, relu,
                    shortcut=None, out_dtype=jnp.bfloat16):
    """out[n, r, :] = [relu]( [sc +] sum_t x_flat[n, g_t, base_t + r, :] @ w[t] + b )."""
    n, ng, L, cin = x_flat.shape
    T, cin_w, coutp = w_taps.shape
    assert cin_w == cin and T == len(taps)

    tn = 256 if coutp % 256 == 0 else 128      # 256-wide output tiles for v6e/v7x MXU
    n_j = coutp // tn
    grid = (n, n_j)

    in_specs = [
        pl.BlockSpec((1, ng, L, cin), lambda i, j: (i, 0, 0, 0)),
        pl.BlockSpec((T, cin, tn), lambda i, j: (0, 0, j)),
        pl.BlockSpec((1, tn), lambda i, j: (0, j)),
    ]
    args = [x_flat, w_taps, bias]
    if shortcut is not None:
        in_specs.append(pl.BlockSpec((1, m_rows, tn), lambda i, j: (i, 0, j)))
        args.append(shortcut)
    out_specs = pl.BlockSpec((1, m_rows, tn), lambda i, j: (i, 0, j))

    kernel = functools.partial(_conv_taps_kernel, taps=tuple(taps),
                               m_rows=m_rows, relu=relu,
                               has_shortcut=shortcut is not None)

    bytes_accessed = (x_flat.size * x_flat.dtype.itemsize * n_j          # x re-read per j
                      + w_taps.size * w_taps.dtype.itemsize * n          # w re-read per n
                      + bias.size * bias.dtype.itemsize * n * n_j
                      + n * m_rows * coutp * jnp.dtype(out_dtype).itemsize)
    if shortcut is not None:
        bytes_accessed += shortcut.size * shortcut.dtype.itemsize
    cost = pl.CostEstimate(flops=2 * n * m_rows * cin * coutp * T,
                           transcendentals=0,
                           bytes_accessed=int(bytes_accessed))

    return pl.pallas_call(
        kernel,
        out_shape=jax.ShapeDtypeStruct((n, m_rows, coutp), out_dtype),
        grid=grid,
        in_specs=in_specs,
        out_specs=out_specs,
        compiler_params=pltpu.CompilerParams(
            dimension_semantics=("parallel", "parallel")),
        cost_estimate=cost,
    )(*args)


# ------------------------------- glue (JAX) ------------------------------------

def _conv3x3_plan(h, w, stride):
    """Output size, phase-plane size and (phase, flat-offset) taps for 3x3/pad=1."""
    ho = (h + 2 - 3) // stride + 1
    wo = (w + 2 - 3) // stride + 1
    halo = (3 - 1) // stride
    hh, wh = ho + halo, wo + halo
    taps = []
    for ky in range(3):
        for kx in range(3):
            g = (ky % stride) * stride + (kx % stride)
            base = (ky // stride) * wh + (kx // stride)
            taps.append((g, base))
    return ho, wo, hh, wh, tuple(taps)


def _phase_flatten(xp, stride, hh, wh, taps, m_rows):
    """Spatially padded NHWC f32 -> (N, stride*stride, L, C) flattened phase planes."""
    n, _, _, c = xp.shape
    planes = []
    for py in range(stride):
        for px in range(stride):
            p = xp[:, py::stride, px::stride, :][:, :hh, :wh, :]
            p = jnp.pad(p, ((0, 0), (0, hh - p.shape[1]),
                            (0, wh - p.shape[2]), (0, 0)))
            planes.append(p)
    xg = jnp.stack(planes, axis=1).reshape(n, stride * stride, hh * wh, c)
    needed = max(b for _, b in taps) + m_rows
    L = _round_up(max(needed, hh * wh), 8)
    return jnp.pad(xg, ((0, 0), (0, 0), (0, L - hh * wh), (0, 0)))


def _fold_weight(w_oihw, scale, coutp, cinp=None):
    """(Cout, Cin, kh, kw) -> (kh*kw, Cinp, Coutp) bf16 with BN scale folded in."""
    cout, cin, kh, kw = w_oihw.shape
    wt = jnp.transpose(w_oihw, (2, 3, 1, 0)).reshape(kh * kw, cin, cout)
    wt = wt.astype(jnp.float32) * scale.reshape(1, 1, cout).astype(jnp.float32)
    if cinp is not None and cinp > cin:
        wt = jnp.pad(wt, ((0, 0), (0, cinp - cin), (0, 0)))   # zero K rows
    wt = jnp.pad(wt, ((0, 0), (0, 0), (0, coutp - cout)))      # zero out columns
    return wt.astype(jnp.bfloat16)


def _fold_bias(bias, coutp):
    c = bias.shape[0]
    return jnp.pad(bias.astype(jnp.float32), (0, coutp - c)).reshape(1, coutp)


def residual_block_forward(x_nchw, params, downsample):
    stride = 2 if downsample else 1
    x = jnp.transpose(x_nchw, (0, 2, 3, 1)).astype(jnp.float32)   # NHWC f32
    n, h, w, cin = x.shape
    cout = params["w1"].shape[0]
    coutp = _round_up(cout, 128)

    # ---- conv1: 3x3 stride s + folded BN1 + ReLU -----------------------------
    ho, wo, hh1, wh1, taps1 = _conv3x3_plan(h, w, stride)
    m1 = ho * wh1
    xp = jnp.pad(x, ((0, 0), (1, 1), (1, 1), (0, 0)))
    x1 = _phase_flatten(xp, stride, hh1, wh1, taps1, m1)
    h1 = _conv_taps_call(
        x1, _fold_weight(params["w1"], params["s1"], coutp),
        _fold_bias(params["b1"], coutp),
        m_rows=m1, taps=taps1, relu=True)                     # (n, m1, coutp) bf16

    # ---- conv2 input: valid columns, spatial re-pad, channels stay padded ----
    ho2, wo2, hh2, wh2, taps2 = _conv3x3_plan(ho, wo, 1)
    m2 = ho2 * wh2
    h1v = h1.reshape(n, ho, wh1, coutp)[:, :, :wo, :].astype(jnp.float32)
    h1p = jnp.pad(h1v, ((0, 0), (1, 1), (1, 1), (0, 0)))
    x2 = _phase_flatten(h1p, 1, hh2, wh2, taps2, m2)
    w2 = _fold_weight(params["w2"], params["s2"], coutp, cinp=coutp)
    b2 = _fold_bias(params["b2"], coutp)

    # ---- shortcut, produced directly in conv2's (m2, coutp) row layout, f32 --
    if downsample:
        xs = x[:, ::2, ::2, :]                                   # (n, ho, wo, cin)
        xs = jnp.pad(xs, ((0, 0), (0, 0), (0, wh2 - wo), (0, 0)))
        Ls = _round_up(m2, 8)
        xs = jnp.pad(xs.reshape(n, 1, m2, cin),
                     ((0, 0), (0, 0), (0, Ls - m2), (0, 0)))
        sc = _conv_taps_call(
            xs, _fold_weight(params["wd"], params["sd"], coutp),
            _fold_bias(params["bd"], coutp),
            m_rows=m2, taps=((0, 0),), relu=False, out_dtype=jnp.float32)
    else:
        assert cin == cout, "identity shortcut requires cin == cout"
        sc = jnp.pad(x, ((0, 0), (0, 0), (0, wh2 - wo), (0, coutp - cin)))
        sc = sc.reshape(n, m2, coutp)

    # ---- conv2 + folded BN2 + shortcut add + ReLU, fused in one kernel -------
    out = _conv_taps_call(x2, w2, b2, m_rows=m2, taps=taps2, relu=True,
                          shortcut=sc)                           # (n, m2, coutp) bf16
    out = out.reshape(n, ho2, wh2, coutp)[:, :, :wo2, :cout]
    return jnp.transpose(out, (0, 3, 1, 2)).astype(jnp.float32)  # back to NCHW


# ------------------------- parameters & reference ------------------------------

def init_params(key, in_channels, downsample):
    cout = in_channels * 2 if downsample else in_channels
    eps = 1e-5
    ks = jax.random.split(key, 16)

    def conv_w(k, co, ci, kh, kw):
        fan_in = ci * kh * kw
        return jax.random.normal(k, (co, ci, kh, kw), jnp.float32) / jnp.sqrt(fan_in)

    def bn_fold(kg, kb, km, c):
        gamma = 1.0 + 0.1 * jax.random.normal(kg, (c,), jnp.float32)
        beta = 0.1 * jax.random.normal(kb, (c,), jnp.float32)
        mean = 0.1 * jax.random.normal(km, (c,), jnp.float32)
        var = jnp.ones((c,), jnp.float32)
        scale = gamma / jnp.sqrt(var + eps)
        bias = beta - mean * scale
        return scale, bias

    params = {}
    params["w1"] = conv_w(ks[0], cout, in_channels, 3, 3)
    params["s1"], params["b1"] = bn_fold(ks[1], ks[2], ks[3], cout)
    params["w2"] = conv_w(ks[4], cout, cout, 3, 3)
    params["s2"], params["b2"] = bn_fold(ks[5], ks[6], ks[7], cout)
    if downsample:
        params["wd"] = conv_w(ks[8], cout, in_channels, 1, 1)
        params["sd"], params["bd"] = bn_fold(ks[9], ks[10], ks[11], cout)
    return params


def ref_forward(x_nchw, params, downsample):
    stride = 2 if downsample else 1

    def conv(x, w, s, pad):
        return jax.lax.conv_general_dilated(
            x, w, (s, s), ((pad, pad), (pad, pad)),
            dimension_numbers=("NCHW", "OIHW", "NCHW"))

    def bn(x, scale, bias):
        return x * scale[None, :, None, None] + bias[None, :, None, None]

    h = jax.nn.relu(bn(conv(x_nchw, params["w1"], stride, 1),
                       params["s1"], params["b1"]))
    r = bn(conv(h, params["w2"], 1, 1), params["s2"], params["b2"])
    if downsample:
        sc = bn(conv(x_nchw, params["wd"], 2, 0), params["sd"], params["bd"])
    else:
        sc = x_nchw
    return jax.nn.relu(sc + r)


# ----------------------------------- main --------------------------------------

if __name__ == "__main__":
    key = jax.random.PRNGKey(0)
    kx, kp1, kp2 = jax.random.split(key, 3)

    in_channels = 4
    x = jax.random.normal(kx, (2, in_channels, 16, 16), jnp.float32)

    for downsample, kp in ((True, kp1), (False, kp2)):
        params = init_params(kp, in_channels, downsample)
        fwd = jax.jit(lambda xx, pp, ds=downsample: residual_block_forward(xx, pp, ds))
        out = jax.block_until_ready(fwd(x, params))
        ref = jax.block_until_ready(ref_forward(x, params, downsample))
        assert out.shape == ref.shape, (out.shape, ref.shape)
        err = float(jnp.max(jnp.abs(out - ref)))
        tol = 5e-2 * (float(jnp.max(jnp.abs(ref))) + 1.0)   # bf16 tolerance
        assert err < tol, (err, tol)

    print("KERNEL_OK")
</pallas_src>

<mosaic_0001>
module attributes {stable_mosaic.version = 11 : i64} {
  func.func @_conv_taps_kernel(%arg0: i32, %arg1: i32, %arg2: memref<1x4x88x4xf32, #tpu.memory_space<vmem>>, %arg3: memref<9x4x128xbf16, #tpu.memory_space<vmem>>, %arg4: memref<1x128xf32, #tpu.memory_space<vmem>>, %arg5: memref<1x72x128xbf16, #tpu.memory_space<vmem>>) attributes {dimension_semantics = [#tpu.dimension_semantics<parallel>, #tpu.dimension_semantics<parallel>], iteration_bounds = array<i64: 2, 1>, scalar_prefetch = 0 : i64, scratch_operands = 0 : i64, tpu.core_type = #tpu.core_type<tc>, window_params = [{transform_indices = @transform_0, window_bounds = array<i64: 1, 4, 88, 4>}, {transform_indices = @transform_1, window_bounds = array<i64: 9, 4, 128>}, {transform_indices = @transform_2, window_bounds = array<i64: 1, 128>}, {transform_indices = @transform_3, window_bounds = array<i64: 1, 72, 128>}]} {
    %c0 = arith.constant 0 : index
    %c0_0 = arith.constant 0 : index
    %c0_1 = arith.constant 0 : index
    %c0_2 = arith.constant 0 : index
    %0 = vector.load %arg2[%c0, %c0_0, %c0_1, %c0_2] : memref<1x4x88x4xf32, #tpu.memory_space<vmem>>, vector<1x1x72x4xf32>
    %1 = vector.shape_cast %0 : vector<1x1x72x4xf32> to vector<72x4xf32>
    %2 = arith.truncf %1 : vector<72x4xf32> to vector<72x4xbf16>
    %c0_3 = arith.constant 0 : index
    %c0_4 = arith.constant 0 : index
    %c0_5 = arith.constant 0 : index
    %3 = vector.load %arg3[%c0_3, %c0_4, %c0_5] : memref<9x4x128xbf16, #tpu.memory_space<vmem>>, vector<1x4x128xbf16>
    %4 = vector.shape_cast %3 : vector<1x4x128xbf16> to vector<4x128xbf16>
    %cst = arith.constant dense<0.000000e+00> : vector<72x128xf32>
    %5 = tpu.matmul %2, %4, %cst {dimension_numbers = #tpu.dot_dimension_numbers<[1], [0], [0], [1], [0, 0, 1, 1], [], []>} : vector<72x4xbf16>, vector<4x128xbf16>, vector<72x128xf32> -> vector<72x128xf32>
    %c0_6 = arith.constant 0 : index
    %c1 = arith.constant 1 : index
    %c0_7 = arith.constant 0 : index
    %c0_8 = arith.constant 0 : index
    %6 = vector.load %arg2[%c0_6, %c1, %c0_7, %c0_8] : memref<1x4x88x4xf32, #tpu.memory_space<vmem>>, vector<1x1x72x4xf32>
    %7 = vector.shape_cast %6 : vector<1x1x72x4xf32> to vector<72x4xf32>
    %8 = arith.truncf %7 : vector<72x4xf32> to vector<72x4xbf16>
    %c1_9 = arith.constant 1 : index
    %c0_10 = arith.constant 0 : index
    %c0_11 = arith.constant 0 : index
    %9 = vector.load %arg3[%c1_9, %c0_10, %c0_11] : memref<9x4x128xbf16, #tpu.memory_space<vmem>>, vector<1x4x128xbf16>
    %10 = vector.shape_cast %9 : vector<1x4x128xbf16> to vector<4x128xbf16>
    %cst_12 = arith.constant dense<0.000000e+00> : vector<72x128xf32>
    %11 = tpu.matmul %8, %10, %cst_12 {dimension_numbers = #tpu.dot_dimension_numbers<[1], [0], [0], [1], [0, 0, 1, 1], [], []>} : vector<72x4xbf16>, vector<4x128xbf16>, vector<72x128xf32> -> vector<72x128xf32>
    %12 = arith.addf %5, %11 : vector<72x128xf32>
    %c0_13 = arith.constant 0 : index
    %c0_14 = arith.constant 0 : index
    %c1_15 = arith.constant 1 : index
    %c0_16 = arith.constant 0 : index
    %13 = vector.load %arg2[%c0_13, %c0_14, %c1_15, %c0_16] : memref<1x4x88x4xf32, #tpu.memory_space<vmem>>, vector<1x1x72x4xf32>
    %14 = vector.shape_cast %13 : vector<1x1x72x4xf32> to vector<72x4xf32>
    %15 = arith.truncf %14 : vector<72x4xf32> to vector<72x4xbf16>
    %c2 = arith.constant 2 : index
    %c0_17 = arith.constant 0 : index
    %c0_18 = arith.constant 0 : index
    %16 = vector.load %arg3[%c2, %c0_17, %c0_18] : memref<9x4x128xbf16, #tpu.memory_space<vmem>>, vector<1x4x128xbf16>
    %17 = vector.shape_cast %16 : vector<1x4x128xbf16> to vector<4x128xbf16>
    %cst_19 = arith.constant dense<0.000000e+00> : vector<72x128xf32>
    %18 = tpu.matmul %15, %17, %cst_19 {dimension_numbers = #tpu.dot_dimension_numbers<[1], [0], [0], [1], [0, 0, 1, 1], [], []>} : vector<72x4xbf16>, vector<4x128xbf16>, vector<72x128xf32> -> vector<72x128xf32>
    %19 = arith.addf %12, %18 : vector<72x128xf32>
    %c0_20 = arith.constant 0 : index
    %c2_21 = arith.constant 2 : index
    %c0_22 = arith.constant 0 : index
    %c0_23 = arith.constant 0 : index
    %20 = vector.load %arg2[%c0_20, %c2_21, %c0_22, %c0_23] : memref<1x4x88x4xf32, #tpu.memory_space<vmem>>, vector<1x1x72x4xf32>
    %21 = vector.shape_cast %20 : vector<1x1x72x4xf32> to vector<72x4xf32>
    %22 = arith.truncf %21 : vector<72x4xf32> to vector<72x4xbf16>
    %c3 = arith.constant 3 : index
    %c0_24 = arith.constant 0 : index
    %c0_25 = arith.constant 0 : index
    %23 = vector.load %arg3[%c3, %c0_24, %c0_25] : memref<9x4x128xbf16, #tpu.memory_space<vmem>>, vector<1x4x128xbf16>
    %24 = vector.shape_cast %23 : vector<1x4x128xbf16> to vector<4x128xbf16>
    %cst_26 = arith.constant dense<0.000000e+00> : vector<72x128xf32>
    %25 = tpu.matmul %22, %24, %cst_26 {dimension_numbers = #tpu.dot_dimension_numbers<[1], [0], [0], [1], [0, 0, 1, 1], [], []>} : vector<72x4xbf16>, vector<4x128xbf16>, vector<72x128xf32> -> vector<72x128xf32>
    %26 = arith.addf %19, %25 : vector<72x128xf32>
    %c0_27 = arith.constant 0 : index
    %c3_28 = arith.constant 3 : index
    %c0_29 = arith.constant 0 : index
    %c0_30 = arith.constant 0 : index
    %27 = vector.load %arg2[%c0_27, %c3_28, %c0_29, %c0_30] : memref<1x4x88x4xf32, #tpu.memory_space<vmem>>, vector<1x1x72x4xf32>
    %28 = vector.shape_cast %27 : vector<1x1x72x4xf32> to vector<72x4xf32>
    %29 = arith.truncf %28 : vector<72x4xf32> to vector<72x4xbf16>
    %c4 = arith.constant 4 : index
    %c0_31 = arith.constant 0 : index
    %c0_32 = arith.constant 0 : index
    %30 = vector.load %arg3[%c4, %c0_31, %c0_32] : memref<9x4x128xbf16, #tpu.memory_space<vmem>>, vector<1x4x128xbf16>
    %31 = vector.shape_cast %30 : vector<1x4x128xbf16> to vector<4x128xbf16>
    %cst_33 = arith.constant dense<0.000000e+00> : vector<72x128xf32>
    %32 = tpu.matmul %29, %31, %cst_33 {dimension_numbers = #tpu.dot_dimension_numbers<[1], [0], [0], [1], [0, 0, 1, 1], [], []>} : vector<72x4xbf16>, vector<4x128xbf16>, vector<72x128xf32> -> vector<72x128xf32>
    %33 = arith.addf %26, %32 : vector<72x128xf32>
    %c0_34 = arith.constant 0 : index
    %c2_35 = arith.constant 2 : index
    %c1_36 = arith.constant 1 : index
    %c0_37 = arith.constant 0 : index
    %34 = vector.load %arg2[%c0_34, %c2_35, %c1_36, %c0_37] : memref<1x4x88x4xf32, #tpu.memory_space<vmem>>, vector<1x1x72x4xf32>
    %35 = vector.shape_cast %34 : vector<1x1x72x4xf32> to vector<72x4xf32>
    %36 = arith.truncf %35 : vector<72x4xf32> to vector<72x4xbf16>
    %c5 = arith.constant 5 : index
    %c0_38 = arith.constant 0 : index
    %c0_39 = arith.constant 0 : index
    %37 = vector.load %arg3[%c5, %c0_38, %c0_39] : memref<9x4x128xbf16, #tpu.memory_space<vmem>>, vector<1x4x128xbf16>
    %38 = vector.shape_cast %37 : vector<1x4x128xbf16> to vector<4x128xbf16>
    %cst_40 = arith.constant dense<0.000000e+00> : vector<72x128xf32>
    %39 = tpu.matmul %36, %38, %cst_40 {dimension_numbers = #tpu.dot_dimension_numbers<[1], [0], [0], [1], [0, 0, 1, 1], [], []>} : vector<72x4xbf16>, vector<4x128xbf16>, vector<72x128xf32> -> vector<72x128xf32>
    %40 = arith.addf %33, %39 : vector<72x128xf32>
    %c0_41 = arith.constant 0 : index
    %c0_42 = arith.constant 0 : index
    %c9 = arith.constant 9 : index
    %c0_43 = arith.constant 0 : index
    %41 = vector.load %arg2[%c0_41, %c0_42, %c9, %c0_43] : memref<1x4x88x4xf32, #tpu.memory_space<vmem>>, vector<1x1x72x4xf32>
    %42 = vector.shape_cast %41 : vector<1x1x72x4xf32> to vector<72x4xf32>
    %43 = arith.truncf %42 : vector<72x4xf32> to vector<72x4xbf16>
    %c6 = arith.constant 6 : index
    %c0_44 = arith.constant 0 : index
    %c0_45 = arith.constant 0 : index
    %44 = vector.load %arg3[%c6, %c0_44, %c0_45] : memref<9x4x128xbf16, #tpu.memory_space<vmem>>, vector<1x4x128xbf16>
    %45 = vector.shape_cast %44 : vector<1x4x128xbf16> to vector<4x128xbf16>
    %cst_46 = arith.constant dense<0.000000e+00> : vector<72x128xf32>
    %46 = tpu.matmul %43, %45, %cst_46 {dimension_numbers = #tpu.dot_dimension_numbers<[1], [0], [0], [1], [0, 0, 1, 1], [], []>} : vector<72x4xbf16>, vector<4x128xbf16>, vector<72x128xf32> -> vector<72x128xf32>
    %47 = arith.addf %40, %46 : vector<72x128xf32>
    %c0_47 = arith.constant 0 : index
    %c1_48 = arith.constant 1 : index
    %c9_49 = arith.constant 9 : index
    %c0_50 = arith.constant 0 : index
    %48 = vector.load %arg2[%c0_47, %c1_48, %c9_49, %c0_50] : memref<1x4x88x4xf32, #tpu.memory_space<vmem>>, vector<1x1x72x4xf32>
    %49 = vector.shape_cast %48 : vector<1x1x72x4xf32> to vector<72x4xf32>
    %50 = arith.truncf %49 : vector<72x4xf32> to vector<72x4xbf16>
    %c7 = arith.constant 7 : index
    %c0_51 = arith.constant 0 : index
    %c0_52 = arith.constant 0 : index
    %51 = vector.load %arg3[%c7, %c0_51, %c0_52] : memref<9x4x128xbf16, #tpu.memory_space<vmem>>, vector<1x4x128xbf16>
    %52 = vector.shape_cast %51 : vector<1x4x128xbf16> to vector<4x128xbf16>
    %cst_53 = arith.constant dense<0.000000e+00> : vector<72x128xf32>
    %53 = tpu.matmul %50, %52, %cst_53 {dimension_numbers = #tpu.dot_dimension_numbers<[1], [0], [0], [1], [0, 0, 1, 1], [], []>} : vector<72x4xbf16>, vector<4x128xbf16>, vector<72x128xf32> -> vector<72x128xf32>
    %54 = arith.addf %47, %53 : vector<72x128xf32>
    %c0_54 = arith.constant 0 : index
    %c0_55 = arith.constant 0 : index
    %c10 = arith.constant 10 : index
    %c0_56 = arith.constant 0 : index
    %55 = vector.load %arg2[%c0_54, %c0_55, %c10, %c0_56] : memref<1x4x88x4xf32, #tpu.memory_space<vmem>>, vector<1x1x72x4xf32>
    %56 = vector.shape_cast %55 : vector<1x1x72x4xf32> to vector<72x4xf32>
    %57 = arith.truncf %56 : vector<72x4xf32> to vector<72x4xbf16>
    %c8 = arith.constant 8 : index
    %c0_57 = arith.constant 0 : index
    %c0_58 = arith.constant 0 : index
    %58 = vector.load %arg3[%c8, %c0_57, %c0_58] : memref<9x4x128xbf16, #tpu.memory_space<vmem>>, vector<1x4x128xbf16>
    %59 = vector.shape_cast %58 : vector<1x4x128xbf16> to vector<4x128xbf16>
    %cst_59 = arith.constant dense<0.000000e+00> : vector<72x128xf32>
    %60 = tpu.matmul %57, %59, %cst_59 {dimension_numbers = #tpu.dot_dimension_numbers<[1], [0], [0], [1], [0, 0, 1, 1], [], []>} : vector<72x4xbf16>, vector<4x128xbf16>, vector<72x128xf32> -> vector<72x128xf32>
    %61 = arith.addf %54, %60 : vector<72x128xf32>
    %c0_60 = arith.constant 0 : index
    %c0_61 = arith.constant 0 : index
    %62 = vector.load %arg4[%c0_60, %c0_61] : memref<1x128xf32, #tpu.memory_space<vmem>>, vector<1x128xf32>
    %63 = vector.broadcast %62 : vector<1x128xf32> to vector<72x128xf32>
    %64 = arith.addf %61, %63 : vector<72x128xf32>
    %cst_62 = arith.constant 0.000000e+00 : f32
    %65 = vector.broadcast %cst_62 : f32 to vector<72x128xf32>
    %66 = arith.maximumf %64, %65 : vector<72x128xf32>
    %67 = arith.truncf %66 : vector<72x128xf32> to vector<72x128xbf16>
    %c0_63 = arith.constant 0 : index
    %c0_64 = arith.constant 0 : index
    %c0_65 = arith.constant 0 : index
    %68 = vector.load %arg5[%c0_63, %c0_64, %c0_65] : memref<1x72x128xbf16, #tpu.memory_space<vmem>>, vector<1x72x128xbf16>
    %69 = vector.shape_cast %68 : vector<1x72x128xbf16> to vector<72x128xbf16>
    %70 = vector.shape_cast %67 : vector<72x128xbf16> to vector<1x72x128xbf16>
    tpu.vector_store %arg5[%c0_63, %c0_64, %c0_65], %70 {strides = array<i32>} : memref<1x72x128xbf16, #tpu.memory_space<vmem>>, vector<1x72x128xbf16>,
    return
  }
  func.func @transform_0(%arg0: i32, %arg1: i32) -> (i32, i32, i32, i32) {
    %c0_i32 = arith.constant 0 : i32
    %c0_i32_0 = arith.constant 0 : i32
    %c0_i32_1 = arith.constant 0 : i32
    %c0_i32_2 = arith.constant 0 : i32
    return %arg0, %c0_i32, %c0_i32_0, %c0_i32_1 : i32, i32, i32, i32
  }
  func.func @transform_1(%arg0: i32, %arg1: i32) -> (i32, i32, i32) {
    %c0_i32 = arith.constant 0 : i32
    %c0_i32_0 = arith.constant 0 : i32
    %c0_i32_1 = arith.constant 0 : i32
    return %c0_i32, %c0_i32_0, %arg1 : i32, i32, i32
  }
  func.func @transform_2(%arg0: i32, %arg1: i32) -> (i32, i32) {
    %c0_i32 = arith.constant 0 : i32
    %c0_i32_0 = arith.constant 0 : i32
    return %c0_i32, %arg1 : i32, i32
  }
  func.func @transform_3(%arg0: i32, %arg1: i32) -> (i32, i32, i32) {
    %c0_i32 = arith.constant 0 : i32
    %c0_i32_0 = arith.constant 0 : i32
    return %arg0, %c0_i32, %arg1 : i32, i32, i32
  }
}

module attributes {stable_mosaic.version = 11 : i64} {
  func.func @_conv_taps_kernel(%arg0: i32, %arg1: i32, %arg2: memref<1x1x80x4xf32, #tpu.memory_space<vmem>>, %arg3: memref<1x4x128xbf16, #tpu.memory_space<vmem>>, %arg4: memref<1x128xf32, #tpu.memory_space<vmem>>, %arg5: memref<1x80x128xf32, #tpu.memory_space<vmem>>) attributes {dimension_semantics = [#tpu.dimension_semantics<parallel>, #tpu.dimension_semantics<parallel>], iteration_bounds = array<i64: 2, 1>, scalar_prefetch = 0 : i64, scratch_operands = 0 : i64, tpu.core_type = #tpu.core_type<tc>, window_params = [{transform_indices = @transform_0, window_bounds = array<i64: 1, 1, 80, 4>}, {transform_indices = @transform_1, window_bounds = array<i64: 1, 4, 128>}, {transform_indices = @transform_2, window_bounds = array<i64: 1, 128>}, {transform_indices = @transform_3, window_bounds = array<i64: 1, 80, 128>}]} {
    %c0 = arith.constant 0 : index
    %c0_0 = arith.constant 0 : index
    %c0_1 = arith.constant 0 : index
    %c0_2 = arith.constant 0 : index
    %0 = vector.load %arg2[%c0, %c0_0, %c0_1, %c0_2] : memref<1x1x80x4xf32, #tpu.memory_space<vmem>>, vector<1x1x80x4xf32>
    %1 = vector.shape_cast %0 : vector<1x1x80x4xf32> to vector<80x4xf32>
    %2 = arith.truncf %1 : vector<80x4xf32> to vector<80x4xbf16>
    %c0_3 = arith.constant 0 : index
    %c0_4 = arith.constant 0 : index
    %c0_5 = arith.constant 0 : index
    %3 = vector.load %arg3[%c0_3, %c0_4, %c0_5] : memref<1x4x128xbf16, #tpu.memory_space<vmem>>, vector<1x4x128xbf16>
    %4 = vector.shape_cast %3 : vector<1x4x128xbf16> to vector<4x128xbf16>
    %cst = arith.constant dense<0.000000e+00> : vector<80x128xf32>
    %5 = tpu.matmul %2, %4, %cst {dimension_numbers = #tpu.dot_dimension_numbers<[1], [0], [0], [1], [0, 0, 1, 1], [], []>} : vector<80x4xbf16>, vector<4x128xbf16>, vector<80x128xf32> -> vector<80x128xf32>
    %c0_6 = arith.constant 0 : index
    %c0_7 = arith.constant 0 : index
    %6 = vector.load %arg4[%c0_6, %c0_7] : memref<1x128xf32, #tpu.memory_space<vmem>>, vector<1x128xf32>
    %7 = vector.broadcast %6 : vector<1x128xf32> to vector<80x128xf32>
    %8 = arith.addf %5, %7 : vector<80x128xf32>
    %c0_8 = arith.constant 0 : index
    %c0_9 = arith.constant 0 : index
    %c0_10 = arith.constant 0 : index
    %9 = vector.load %arg5[%c0_8, %c0_9, %c0_10] : memref<1x80x128xf32, #tpu.memory_space<vmem>>, vector<1x80x128xf32>
    %10 = vector.shape_cast %9 : vector<1x80x128xf32> to vector<80x128xf32>
    %11 = vector.shape_cast %8 : vector<80x128xf32> to vector<1x80x128xf32>
    tpu.vector_store %arg5[%c0_8, %c0_9, %c0_10], %11 {strides = array<i32>} : memref<1x80x128xf32, #tpu.memory_space<vmem>>, vector<1x80x128xf32>,
    return
  }
  func.func @transform_0(%arg0: i32, %arg1: i32) -> (i32, i32, i32, i32) {
    %c0_i32 = arith.constant 0 : i32
    %c0_i32_0 = arith.constant 0 : i32
    %c0_i32_1 = arith.constant 0 : i32
    %c0_i32_2 = arith.constant 0 : i32
    return %arg0, %c0_i32, %c0_i32_0, %c0_i32_1 : i32, i32, i32, i32
  }
  func.func @transform_1(%arg0: i32, %arg1: i32) -> (i32, i32, i32) {
    %c0_i32 = arith.constant 0 : i32
    %c0_i32_0 = arith.constant 0 : i32
    %c0_i32_1 = arith.constant 0 : i32
    return %c0_i32, %c0_i32_0, %arg1 : i32, i32, i32
  }
  func.func @transform_2(%arg0: i32, %arg1: i32) -> (i32, i32) {
    %c0_i32 = arith.constant 0 : i32
    %c0_i32_0 = arith.constant 0 : i32
    return %c0_i32, %arg1 : i32, i32
  }
  func.func @transform_3(%arg0: i32, %arg1: i32) -> (i32, i32, i32) {
    %c0_i32 = arith.constant 0 : i32
    %c0_i32_0 = arith.constant 0 : i32
    return %arg0, %c0_i32, %arg1 : i32, i32, i32
  }
}

module attributes {stable_mosaic.version = 11 : i64} {
  func.func @_conv_taps_kernel(%arg0: i32, %arg1: i32, %arg2: memref<1x1x104x128xf32, #tpu.memory_space<vmem>>, %arg3: memref<9x128x128xbf16, #tpu.memory_space<vmem>>, %arg4: memref<1x128xf32, #tpu.memory_space<vmem>>, %arg5: memref<1x80x128xf32, #tpu.memory_space<vmem>>, %arg6: memref<1x80x128xbf16, #tpu.memory_space<vmem>>) attributes {dimension_semantics = [#tpu.dimension_semantics<parallel>, #tpu.dimension_semantics<parallel>], iteration_bounds = array<i64: 2, 1>, scalar_prefetch = 0 : i64, scratch_operands = 0 : i64, tpu.core_type = #tpu.core_type<tc>, window_params = [{transform_indices = @transform_0, window_bounds = array<i64: 1, 1, 104, 128>}, {transform_indices = @transform_1, window_bounds = array<i64: 9, 128, 128>}, {transform_indices = @transform_2, window_bounds = array<i64: 1, 128>}, {transform_indices = @transform_3, window_bounds = array<i64: 1, 80, 128>}, {transform_indices = @transform_4, window_bounds = array<i64: 1, 80, 128>}]} {
    %c0 = arith.constant 0 : index
    %c0_0 = arith.constant 0 : index
    %c0_1 = arith.constant 0 : index
    %c0_2 = arith.constant 0 : index
    %0 = vector.load %arg2[%c0, %c0_0, %c0_1, %c0_2] : memref<1x1x104x128xf32, #tpu.memory_space<vmem>>, vector<1x1x80x128xf32>
    %1 = vector.shape_cast %0 : vector<1x1x80x128xf32> to vector<80x128xf32>
    %2 = arith.truncf %1 : vector<80x128xf32> to vector<80x128xbf16>
    %c0_3 = arith.constant 0 : index
    %c0_4 = arith.constant 0 : index
    %c0_5 = arith.constant 0 : index
    %3 = vector.load %arg3[%c0_3, %c0_4, %c0_5] : memref<9x128x128xbf16, #tpu.memory_space<vmem>>, vector<1x128x128xbf16>
    %4 = vector.shape_cast %3 : vector<1x128x128xbf16> to vector<128x128xbf16>
    %cst = arith.constant dense<0.000000e+00> : vector<80x128xf32>
    %5 = tpu.matmul %2, %4, %cst {dimension_numbers = #tpu.dot_dimension_numbers<[1], [0], [0], [1], [0, 0, 1, 1], [], []>} : vector<80x128xbf16>, vector<128x128xbf16>, vector<80x128xf32> -> vector<80x128xf32>
    %c0_6 = arith.constant 0 : index
    %c0_7 = arith.constant 0 : index
    %c1 = arith.constant 1 : index
    %c0_8 = arith.constant 0 : index
    %6 = vector.load %arg2[%c0_6, %c0_7, %c1, %c0_8] : memref<1x1x104x128xf32, #tpu.memory_space<vmem>>, vector<1x1x80x128xf32>
    %7 = vector.shape_cast %6 : vector<1x1x80x128xf32> to vector<80x128xf32>
    %8 = arith.truncf %7 : vector<80x128xf32> to vector<80x128xbf16>
    %c1_9 = arith.constant 1 : index
    %c0_10 = arith.constant 0 : index
    %c0_11 = arith.constant 0 : index
    %9 = vector.load %arg3[%c1_9, %c0_10, %c0_11] : memref<9x128x128xbf16, #tpu.memory_space<vmem>>, vector<1x128x128xbf16>
    %10 = vector.shape_cast %9 : vector<1x128x128xbf16> to vector<128x128xbf16>
    %cst_12 = arith.constant dense<0.000000e+00> : vector<80x128xf32>
    %11 = tpu.matmul %8, %10, %cst_12 {dimension_numbers = #tpu.dot_dimension_numbers<[1], [0], [0], [1], [0, 0, 1, 1], [], []>} : vector<80x128xbf16>, vector<128x128xbf16>, vector<80x128xf32> -> vector<80x128xf32>
    %12 = arith.addf %5, %11 : vector<80x128xf32>
    %c0_13 = arith.constant 0 : index
    %c0_14 = arith.constant 0 : index
    %c2 = arith.constant 2 : index
    %c0_15 = arith.constant 0 : index
    %13 = vector.load %arg2[%c0_13, %c0_14, %c2, %c0_15] : memref<1x1x104x128xf32, #tpu.memory_space<vmem>>, vector<1x1x80x128xf32>
    %14 = vector.shape_cast %13 : vector<1x1x80x128xf32> to vector<80x128xf32>
    %15 = arith.truncf %14 : vector<80x128xf32> to vector<80x128xbf16>
    %c2_16 = arith.constant 2 : index
    %c0_17 = arith.constant 0 : index
    %c0_18 = arith.constant 0 : index
    %16 = vector.load %arg3[%c2_16, %c0_17, %c0_18] : memref<9x128x128xbf16, #tpu.memory_space<vmem>>, vector<1x128x128xbf16>
    %17 = vector.shape_cast %16 : vector<1x128x128xbf16> to vector<128x128xbf16>
    %cst_19 = arith.constant dense<0.000000e+00> : vector<80x128xf32>
    %18 = tpu.matmul %15, %17, %cst_19 {dimension_numbers = #tpu.dot_dimension_numbers<[1], [0], [0], [1], [0, 0, 1, 1], [], []>} : vector<80x128xbf16>, vector<128x128xbf16>, vector<80x128xf32> -> vector<80x128xf32>
    %19 = arith.addf %12, %18 : vector<80x128xf32>
    %c0_20 = arith.constant 0 : index
    %c0_21 = arith.constant 0 : index
    %c10 = arith.constant 10 : index
    %c0_22 = arith.constant 0 : index
    %20 = vector.load %arg2[%c0_20, %c0_21, %c10, %c0_22] : memref<1x1x104x128xf32, #tpu.memory_space<vmem>>, vector<1x1x80x128xf32>
    %21 = vector.shape_cast %20 : vector<1x1x80x128xf32> to vector<80x128xf32>
    %22 = arith.truncf %21 : vector<80x128xf32> to vector<80x128xbf16>
    %c3 = arith.constant 3 : index
    %c0_23 = arith.constant 0 : index
    %c0_24 = arith.constant 0 : index
    %23 = vector.load %arg3[%c3, %c0_23, %c0_24] : memref<9x128x128xbf16, #tpu.memory_space<vmem>>, vector<1x128x128xbf16>
    %24 = vector.shape_cast %23 : vector<1x128x128xbf16> to vector<128x128xbf16>
    %cst_25 = arith.constant dense<0.000000e+00> : vector<80x128xf32>
    %25 = tpu.matmul %22, %24, %cst_25 {dimension_numbers = #tpu.dot_dimension_numbers<[1], [0], [0], [1], [0, 0, 1, 1], [], []>} : vector<80x128xbf16>, vector<128x128xbf16>, vector<80x128xf32> -> vector<80x128xf32>
    %26 = arith.addf %19, %25 : vector<80x128xf32>
    %c0_26 = arith.constant 0 : index
    %c0_27 = arith.constant 0 : index
    %c11 = arith.constant 11 : index
    %c0_28 = arith.constant 0 : index
    %27 = vector.load %arg2[%c0_26, %c0_27, %c11, %c0_28] : memref<1x1x104x128xf32, #tpu.memory_space<vmem>>, vector<1x1x80x128xf32>
    %28 = vector.shape_cast %27 : vector<1x1x80x128xf32> to vector<80x128xf32>
    %29 = arith.truncf %28 : vector<80x128xf32> to vector<80x128xbf16>
    %c4 = arith.constant 4 : index
    %c0_29 = arith.constant 0 : index
    %c0_30 = arith.constant 0 : index
    %30 = vector.load %arg3[%c4, %c0_29, %c0_30] : memref<9x128x128xbf16, #tpu.memory_space<vmem>>, vector<1x128x128xbf16>
    %31 = vector.shape_cast %30 : vector<1x128x128xbf16> to vector<128x128xbf16>
    %cst_31 = arith.constant dense<0.000000e+00> : vector<80x128xf32>
    %32 = tpu.matmul %29, %31, %cst_31 {dimension_numbers = #tpu.dot_dimension_numbers<[1], [0], [0], [1], [0, 0, 1, 1], [], []>} : vector<80x128xbf16>, vector<128x128xbf16>, vector<80x128xf32> -> vector<80x128xf32>
    %33 = arith.addf %26, %32 : vector<80x128xf32>
    %c0_32 = arith.constant 0 : index
    %c0_33 = arith.constant 0 : index
    %c12 = arith.constant 12 : index
    %c0_34 = arith.constant 0 : index
    %34 = vector.load %arg2[%c0_32, %c0_33, %c12, %c0_34] : memref<1x1x104x128xf32, #tpu.memory_space<vmem>>, vector<1x1x80x128xf32>
    %35 = vector.shape_cast %34 : vector<1x1x80x128xf32> to vector<80x128xf32>
    %36 = arith.truncf %35 : vector<80x128xf32> to vector<80x128xbf16>
    %c5 = arith.constant 5 : index
    %c0_35 = arith.constant 0 : index
    %c0_36 = arith.constant 0 : index
    %37 = vector.load %arg3[%c5, %c0_35, %c0_36] : memref<9x128x128xbf16, #tpu.memory_space<vmem>>, vector<1x128x128xbf16>
    %38 = vector.shape_cast %37 : vector<1x128x128xbf16> to vector<128x128xbf16>
    %cst_37 = arith.constant dense<0.000000e+00> : vector<80x128xf32>
    %39 = tpu.matmul %36, %38, %cst_37 {dimension_numbers = #tpu.dot_dimension_numbers<[1], [0], [0], [1], [0, 0, 1, 1], [], []>} : vector<80x128xbf16>, vector<128x128xbf16>, vector<80x128xf32> -> vector<80x128xf32>
    %40 = arith.addf %33, %39 : vector<80x128xf32>
    %c0_38 = arith.constant 0 : index
    %c0_39 = arith.constant 0 : index
    %c20 = arith.constant 20 : index
    %c0_40 = arith.constant 0 : index
    %41 = vector.load %arg2[%c0_38, %c0_39, %c20, %c0_40] : memref<1x1x104x128xf32, #tpu.memory_space<vmem>>, vector<1x1x80x128xf32>
    %42 = vector.shape_cast %41 : vector<1x1x80x128xf32> to vector<80x128xf32>
    %43 = arith.truncf %42 : vector<80x128xf32> to vector<80x128xbf16>
    %c6 = arith.constant 6 : index
    %c0_41 = arith.constant 0 : index
    %c0_42 = arith.constant 0 : index
    %44 = vector.load %arg3[%c6, %c0_41, %c0_42] : memref<9x128x128xbf16, #tpu.memory_space<vmem>>, vector<1x128x128xbf16>
    %45 = vector.shape_cast %44 : vector<1x128x128xbf16> to vector<128x128xbf16>
    %cst_43 = arith.constant dense<0.000000e+00> : vector<80x128xf32>
    %46 = tpu.matmul %43, %45, %cst_43 {dimension_numbers = #tpu.dot_dimension_numbers<[1], [0], [0], [1], [0, 0, 1, 1], [], []>} : vector<80x128xbf16>, vector<128x128xbf16>, vector<80x128xf32> -> vector<80x128xf32>
    %47 = arith.addf %40, %46 : vector<80x128xf32>
    %c0_44 = arith.constant 0 : index
    %c0_45 = arith.constant 0 : index
    %c21 = arith.constant 21 : index
    %c0_46 = arith.constant 0 : index
    %48 = vector.load %arg2[%c0_44, %c0_45, %c21, %c0_46] : memref<1x1x104x128xf32, #tpu.memory_space<vmem>>, vector<1x1x80x128xf32>
    %49 = vector.shape_cast %48 : vector<1x1x80x128xf32> to vector<80x128xf32>
    %50 = arith.truncf %49 : vector<80x128xf32> to vector<80x128xbf16>
    %c7 = arith.constant 7 : index
    %c0_47 = arith.constant 0 : index
    %c0_48 = arith.constant 0 : index
    %51 = vector.load %arg3[%c7, %c0_47, %c0_48] : memref<9x128x128xbf16, #tpu.memory_space<vmem>>, vector<1x128x128xbf16>
    %52 = vector.shape_cast %51 : vector<1x128x128xbf16> to vector<128x128xbf16>
    %cst_49 = arith.constant dense<0.000000e+00> : vector<80x128xf32>
    %53 = tpu.matmul %50, %52, %cst_49 {dimension_numbers = #tpu.dot_dimension_numbers<[1], [0], [0], [1], [0, 0, 1, 1], [], []>} : vector<80x128xbf16>, vector<128x128xbf16>, vector<80x128xf32> -> vector<80x128xf32>
    %54 = arith.addf %47, %53 : vector<80x128xf32>
    %c0_50 = arith.constant 0 : index
    %c0_51 = arith.constant 0 : index
    %c22 = arith.constant 22 : index
    %c0_52 = arith.constant 0 : index
    %55 = vector.load %arg2[%c0_50, %c0_51, %c22, %c0_52] : memref<1x1x104x128xf32, #tpu.memory_space<vmem>>, vector<1x1x80x128xf32>
    %56 = vector.shape_cast %55 : vector<1x1x80x128xf32> to vector<80x128xf32>
    %57 = arith.truncf %56 : vector<80x128xf32> to vector<80x128xbf16>
    %c8 = arith.constant 8 : index
    %c0_53 = arith.constant 0 : index
    %c0_54 = arith.constant 0 : index
    %58 = vector.load %arg3[%c8, %c0_53, %c0_54] : memref<9x128x128xbf16, #tpu.memory_space<vmem>>, vector<1x128x128xbf16>
    %59 = vector.shape_cast %58 : vector<1x128x128xbf16> to vector<128x128xbf16>
    %cst_55 = arith.constant dense<0.000000e+00> : vector<80x128xf32>
    %60 = tpu.matmul %57, %59, %cst_55 {dimension_numbers = #tpu.dot_dimension_numbers<[1], [0], [0], [1], [0, 0, 1, 1], [], []>} : vector<80x128xbf16>, vector<128x128xbf16>, vector<80x128xf32> -> vector<80x128xf32>
    %61 = arith.addf %54, %60 : vector<80x128xf32>
    %c0_56 = arith.constant 0 : index
    %c0_57 = arith.constant 0 : index
    %62 = vector.load %arg4[%c0_56, %c0_57] : memref<1x128xf32, #tpu.memory_space<vmem>>, vector<1x128xf32>
    %63 = vector.broadcast %62 : vector<1x128xf32> to vector<80x128xf32>
    %64 = arith.addf %61, %63 : vector<80x128xf32>
    %c0_58 = arith.constant 0 : index
    %c0_59 = arith.constant 0 : index
    %c0_60 = arith.constant 0 : index
    %65 = vector.load %arg5[%c0_58, %c0_59, %c0_60] : memref<1x80x128xf32, #tpu.memory_space<vmem>>, vector<1x80x128xf32>
    %66 = vector.shape_cast %65 : vector<1x80x128xf32> to vector<80x128xf32>
    %67 = arith.addf %64, %66 : vector<80x128xf32>
    %cst_61 = arith.constant 0.000000e+00 : f32
    %68 = vector.broadcast %cst_61 : f32 to vector<80x128xf32>
    %69 = arith.maximumf %67, %68 : vector<80x128xf32>
    %70 = arith.truncf %69 : vector<80x128xf32> to vector<80x128xbf16>
    %c0_62 = arith.constant 0 : index
    %c0_63 = arith.constant 0 : index
    %c0_64 = arith.constant 0 : index
    %71 = vector.load %arg6[%c0_62, %c0_63, %c0_64] : memref<1x80x128xbf16, #tpu.memory_space<vmem>>, vector<1x80x128xbf16>
    %72 = vector.shape_cast %71 : vector<1x80x128xbf16> to vector<80x128xbf16>
    %73 = vector.shape_cast %70 : vector<80x128xbf16> to vector<1x80x128xbf16>
    tpu.vector_store %arg6[%c0_62, %c0_63, %c0_64], %73 {strides = array<i32>} : memref<1x80x128xbf16, #tpu.memory_space<vmem>>, vector<1x80x128xbf16>,
    return
  }
  func.func @transform_0(%arg0: i32, %arg1: i32) -> (i32, i32, i32, i32) {
    %c0_i32 = arith.constant 0 : i32
    %c0_i32_0 = arith.constant 0 : i32
    %c0_i32_1 = arith.constant 0 : i32
    %c0_i32_2 = arith.constant 0 : i32
    return %arg0, %c0_i32, %c0_i32_0, %c0_i32_1 : i32, i32, i32, i32
  }
  func.func @transform_1(%arg0: i32, %arg1: i32) -> (i32, i32, i32) {
    %c0_i32 = arith.constant 0 : i32
    %c0_i32_0 = arith.constant 0 : i32
    %c0_i32_1 = arith.constant 0 : i32
    return %c0_i32, %c0_i32_0, %arg1 : i32, i32, i32
  }
  func.func @transform_2(%arg0: i32, %arg1: i32) -> (i32, i32) {
    %c0_i32 = arith.constant 0 : i32
    %c0_i32_0 = arith.constant 0 : i32
    return %c0_i32, %arg1 : i32, i32
  }
  func.func @transform_3(%arg0: i32, %arg1: i32) -> (i32, i32, i32) {
    %c0_i32 = arith.constant 0 : i32
    %c0_i32_0 = arith.constant 0 : i32
    return %arg0, %c0_i32, %arg1 : i32, i32, i32
  }
  func.func @transform_4(%arg0: i32, %arg1: i32) -> (i32, i32, i32) {
    %c0_i32 = arith.constant 0 : i32
    %c0_i32_0 = arith.constant 0 : i32
    return %arg0, %c0_i32, %arg1 : i32, i32, i32
  }
}

</mosaic_0001>

<bundles_post_ra>
// kernel: _lambda_.4
= control target key start
LH: loop header
LB: loop body
LE: loop exit
PB: predicated region body
PF: predicated region fallthrough
CT: control target
= control target key end

     0   :  { %s574_s12 = smov 0   ;;  %s576_s13 = smov 0   ;;  %s638_s0 = inlined_call_operand.vmem [shape: f32[2,1,80,4], index: 0, kind: input, shape index: {}]   ;;  %s639_s1 = inlined_call_operand.vmem [shape: bf16[1,4,128], index: 1, kind: input, shape index: {}]   ;;  %s640_s2 = inlined_call_operand.vmem [shape: f32[1,128], index: 2, kind: input, shape index: {}]   ;;  %s641_s3 = inlined_call_operand.vmem [shape: f32[2,80,128], index: 3, kind: output, shape index: {}]  }
   0x1   :  { %s578_s14 = smov 0  }
   0x2 LB: > { %s25_s15 = sadd.s32 1, %s546_s13  ;;  %p460_p0 = scmp.ge.s32.totalorder %s550_s14, 1  ;;  %s550_s14 = sphi %s578_s14, %s13_s14   ;;  %s546_s13 = sphi %s576_s13, %s643_s13   ;;  %s542_s12 = sphi %s574_s12, %s642_s12  }
   0x3   : > { %p27_p1 = scmp.ge.s32.totalorder %s25_s15, 2  ;;  %p168_p2 = scmp.lt.s32.totalorder %s550_s14, 3 }
   0x5   : > { %s645_s15 = smov (%p27_p1, %s25_s15), 0  ;;  %p169_p3 = pnand %p460_p0, %p168_p2 }
   0x6   : > { %p202_p4 = scmp.lt.s32.totalorder (!%p169_p3), %s542_s12, 1 }
   0x7   : > { %172 = sbr.rel (%p169_p3) target bundleno = 235 (0xeb), region = 32 }
   0xc   : > { %v238_v0 = vld [vmem:[%s639_s1] sm:$0x3]  ;;  %vm262_vm0 = vcmask 1041408   ;;  %v552_v1 = vmov 0.0   ;;  %s647_s12 = smov (!%p202_p4, %s542_s12), 1  ;;  %vm553_vm1 = vmmov 0  }
   0xd   : > { %477 = vmatprep.subr.bf16.mxu0 %v552_v1  ;;  %v264_v2 = vsel %vm262_vm0, %v238_v0, 0  ;;  %499 = vmatprep.subr.bf16.mxu1 %v552_v1  ;;  %s501_s18 = smul.u32 80, %s647_s12  ;;  %vm246_vm2 = vcmask 31744   ;;  %v463_v18 = vld [vmem:[%s640_s2] ss:$0 sm:$0xff] }
   0xe   : > { %478 = vmatpush3.bf16.msra.mxu0 %v264_v2  ;;  %500 = vmatpush3.bf16.msra.mxu1 %v264_v2 }
   0xf   : > { %479 = vmatprep.mubr.msk.bf16.mxu0 %vm553_vm1, %v552_v1  ;;  %491 = vmatprep.mubr.msk.bf16.mxu1 %vm553_vm1, %v552_v1  ;;  %s206_s21 = scalar_lea.vmem %s638_s0, %s501_s18  ;;  %s617_s26 = scalar_lea.vmem %s641_s3, %s501_s18 }
  0x10   : > { %v223_v3 = vld [vmem:[%s206_s21] sm:$0xff]  ;;  %v224_v4 = vld [vmem:[%s206_s21 + $0x8] sm:$0xff]  ;;  %v229_v5 = vld [vmem:[%s206_s21 + $0x30] sm:$0xff] }
  0x11   : > { %v233_v6 = vpack.c.bf16 %v224_v4, %v223_v3  ;;  %v230_v7 = vld [vmem:[%s206_s21 + $0x38] sm:$0xff]  ;;  %v225_v9 = vld [vmem:[%s206_s21 + $0x10] sm:$0xff]  ;;  %v231_v11 = vld [vmem:[%s206_s21 + $0x40] sm:$0xff] }
  0x12   : > { %v236_v8 = vpack.c.bf16 %v230_v7, %v229_v5  ;;  %v226_v10 = vld [vmem:[%s206_s21 + $0x18] sm:$0xff]  ;;  %v232_v12 = vld [vmem:[%s206_s21 + $0x48] sm:$0xff]  ;;  %v227_v15 = vld [vmem:[%s206_s21 + $0x20] sm:$0xff] }
  0x13   : > { %480 = vmatmul.mubr.msk.bf16.vlgmr.msra.gmra.mxu0 %vm246_vm2, %v233_v6  ;;  %v234_v13 = vpack.c.bf16 %v226_v10, %v225_v9  ;;  %v237_v14 = vpack.c.bf16 %v232_v12, %v231_v11  ;;  %v228_v16 = vld [vmem:[%s206_s21 + $0x28] sm:$0xff] }
  0x14   : > { %492 = vmatmul.mubr.msk.bf16.vlgmr.msra.gmra.mxu1 %vm246_vm2, %v236_v8  ;;  %483 = vmatprep.mubr.msk.bf16.mxu0 %vm553_vm1, %v552_v1  ;;  %v235_v17 = vpack.c.bf16 %v228_v16, %v227_v15 }
  0x15   : > { %495 = vmatprep.mubr.msk.bf16.mxu1 %vm553_vm1, %v552_v1 }
  0x1b   : > { %484 = vmatmul.mubr.msk.bf16.gmra.mxu0 %vm246_vm2, %v234_v13 }
  0x1c   : > { %496 = vmatmul.mubr.msk.bf16.gmra.mxu1 %vm246_vm2, %v237_v14  ;;  %487 = vmatprep.mubr.msk.bf16.mxu0 %vm553_vm1, %v552_v1 }
  0x23   : > { %488 = vmatmul.mubr.msk.bf16.gmra.mxu0 %vm246_vm2, %v235_v17 }
  0xd3   : > { %v300_v19 = vpop.f32.mrf.mxu0 }
  0xd4   : > { %v301_v20 = vadd.f32 %v463_v18, %v300_v19  ;;  %v324_v21 = vpop.f32.mrf.mxu1 }
  0xd5   : > { %v481_v22 = vpop.f32.mrf.mxu0  ;;  %v325_v23 = vadd.f32 %v463_v18, %v324_v21 }
  0xd6   : > { %339 = vst [vmem:[%s617_s26] sm:$0xff] %v301_v20  ;;  %v493_v24 = vpop.f32.mrf.mxu1 }
  0xd7   : > { %345 = vst [vmem:[%s617_s26 + $0x30] sm:$0xff] %v325_v23  ;;  %v303_v25 = vpop.f32.mrf.mxu0 }
  0xd8   : > { %v304_v26 = vadd.f32 %v463_v18, %v303_v25  ;;  %v327_v27 = vpop.f32.mrf.mxu1 }
  0xd9   : > { %v482_v28 = vpop.f32.mrf.mxu0  ;;  %v328_v29 = vadd.f32 %v463_v18, %v327_v27 }
  0xda   : > { %340 = vst [vmem:[%s617_s26 + $0x8] sm:$0xff] %v304_v26  ;;  %v494_v30 = vpop.f32.mrf.mxu1 }
  0xdb   : > { %346 = vst [vmem:[%s617_s26 + $0x38] sm:$0xff] %v328_v29  ;;  %v308_v31 = vpop.f32.mrf.mxu0 }
  0xdc   : > { %v309_v32 = vadd.f32 %v463_v18, %v308_v31  ;;  %v332_v33 = vpop.f32.mrf.mxu1 }
  0xdd   : > { %v485_v34 = vpop.f32.mrf.mxu0  ;;  %v333_v35 = vadd.f32 %v463_v18, %v332_v33 }
  0xde   : > { %341 = vst [vmem:[%s617_s26 + $0x10] sm:$0xff] %v309_v32  ;;  %v497_v36 = vpop.f32.mrf.mxu1 }
  0xdf   : > { %347 = vst [vmem:[%s617_s26 + $0x40] sm:$0xff] %v333_v35  ;;  %v311_v37 = vpop.f32.mrf.mxu0 }
  0xe0   : > { %v312_v38 = vadd.f32 %v463_v18, %v311_v37  ;;  %v335_v39 = vpop.f32.mrf.mxu1 }
  0xe1   : > { %v486_v40 = vpop.f32.mrf.mxu0  ;;  %v336_v41 = vadd.f32 %v463_v18, %v335_v39 }
  0xe2   : > { %342 = vst [vmem:[%s617_s26 + $0x18] sm:$0xff] %v312_v38  ;;  %v498_v42 = vpop.f32.mrf.mxu1 }
  0xe3   : > { %348 = vst [vmem:[%s617_s26 + $0x48] sm:$0xff] %v336_v41  ;;  %v316_v43 = vpop.f32.mrf.mxu0 }
  0xe4   : > { %v317_v44 = vadd.f32 %v463_v18, %v316_v43 }
  0xe5   : > { %v489_v45 = vpop.f32.mrf.mxu0 }
  0xe6   : > { %343 = vst [vmem:[%s617_s26 + $0x20] sm:$0xff] %v317_v44 }
  0xe7   : > { %v319_v46 = vpop.f32.mrf.mxu0 }
  0xe8   : > { %v320_v47 = vadd.f32 %v463_v18, %v319_v46 }
  0xe9   : > { %v490_v48 = vpop.f32.mrf.mxu0 }
  0xea   : > { %344 = vst [vmem:[%s617_s26 + $0x28] sm:$0xff] %v320_v47 }
  0xeb PF: > { %s13_s14 = sadd.s32 1, %s550_s14   ;;  %s642_s12 = smov %s546_s13 }
  0xec   : > { %p10_p5 = scmp.ge.s32.totalorder %s13_s14, 4   ;;  %s643_s13 = smov %s645_s15 }
  0xee   :  { %12 = sbr.rel (!%p10_p5) target bundleno = 2 (0x2), region = 68 }

// kernel: _lambda_.3
= control target key start
LH: loop header
LB: loop body
LE: loop exit
PB: predicated region body
PF: predicated region fallthrough
CT: control target
= control target key end

     0   :  { %s1899_s12 = smov 0   ;;  %s1901_s13 = smov 0   ;;  %s2312_s0 = inlined_call_operand.vmem [shape: f32[2,4,88,4], index: 0, kind: input, shape index: {}]   ;;  %s2313_s1 = inlined_call_operand.vmem [shape: bf16[9,4,128], index: 1, kind: input, shape index: {}]   ;;  %s2314_s2 = inlined_call_operand.vmem [shape: f32[1,128], index: 2, kind: input, shape index: {}]   ;;  %s2315_s3 = inlined_call_operand.vmem [shape: bf16[2,72,128], index: 3, kind: output, shape index: {}]  }
   0x1   :  { %s1903_s14 = smov 0  }
   0x2 LB: > { %s25_s15 = sadd.s32 1, %s1871_s13  ;;  %p1426_p0 = scmp.ge.s32.totalorder %s1875_s14, 1  ;;  %s1875_s14 = sphi %s1903_s14, %s13_s14   ;;  %s1871_s13 = sphi %s1901_s13, %s2317_s13   ;;  %s1867_s12 = sphi %s1899_s12, %s2316_s12  }
   0x3   : > { %p27_p1 = scmp.ge.s32.totalorder %s25_s15, 2  ;;  %p168_p2 = scmp.lt.s32.totalorder %s1875_s14, 3 }
   0x5   : > { %s2319_s15 = smov (%p27_p1, %s25_s15), 0  ;;  %p169_p3 = pnand %p1426_p0, %p168_p2 }
   0x6   : > { %p202_p4 = scmp.lt.s32.totalorder (!%p169_p3), %s1867_s12, 1 }
   0x7   : > { %172 = sbr.rel (%p169_p3) target bundleno = 397 (0x18d), region = 32 }
   0xc   : > { %v1438_v0 = vld [vmem:[%s2313_s1 + $0x2] sm:$0x3]  ;;  %vm271_vm0 = vcmask 1041408   ;;  %v1877_v1 = vmov 0.0   ;;  %s2321_s12 = smov (!%p202_p4, %s1867_s12), 1  ;;  %vm1878_vm1 = vmmov 0  }
   0xd   : > { %1625 = vmatprep.subr.bf16.mxu0 %v1877_v1  ;;  %1823 = vmatprep.subr.bf16.mxu1 %v1877_v1  ;;  %v273_v2 = vsel %vm271_vm0, %v1438_v0, 0  ;;  %s1825_s18 = smul.u32 352, %s2321_s12  ;;  %v1449_v3 = vld [vmem:[%s2313_s1 + $0x4] sm:$0x3]  ;;  %v237_v4 = vld [vmem:[%s2313_s1] sm:$0x3] }
   0xe   : > { %1626 = vmatpush3.bf16.msra.mxu0 %v273_v2  ;;  %1824 = vmatpush3.bf16.msra.mxu1 %v273_v2  ;;  %vm255_vm2 = vcmask 31744   ;;  %v469_v10 = vsel %vm271_vm0, %v1449_v3, 0  ;;  %v363_v12 = vsel %vm271_vm0, %v237_v4, 0  ;;  %v1464_v35 = vld [vmem:[%s2313_s1 + $0x6] sm:$0x3]  ;;  %s1826_s17 = smul.u32 36, %s2321_s12 }
   0xf   : > { %1627 = vmatprep.mubr.msk.bf16.mxu0 %vm1878_vm1, %v1877_v1  ;;  %1639 = vmatprep.mubr.msk.bf16.mxu1 %vm1878_vm1, %v1877_v1  ;;  %s1938_s23 = scalar_lea.vmem %s2312_s0, %s1825_s18  ;;  %v585_v37 = vsel %vm271_vm0, %v1464_v35, 0  ;;  %v1479_v41 = vld [vmem:[%s2313_s1 + $0x8] sm:$0x3]  ;;  %v1494_v59 = vld [vmem:[%s2313_s1 + $0xa] sm:$0x3] }
  0x10   : > { %1669 = vmatprep.subr.bf16.mxu0 %v1877_v1  ;;  %1647 = vmatprep.subr.bf16.mxu1 %v1877_v1  ;;  %v1429_v5 = vld [vmem:[%s1938_s23 + $0x58] sm:$0xff]  ;;  %v1430_v6 = vld [vmem:[%s1938_s23 + $0x60] sm:$0xff]  ;;  %v1435_v7 = vld [vmem:[%s1938_s23 + $0x88] sm:$0xff]  ;;  %v701_v44 = vsel %vm271_vm0, %v1479_v41, 0  ;;  %v816_v61 = vsel %vm271_vm0, %v1494_v59, 0  ;;  %s2275_s20 = scalar_lea.vmem %s2315_s3, %s1826_s17 }
  0x11   : > { %v248_v8 = vpack.c.bf16 %v1430_v6, %v1429_v5  ;;  %v1436_v9 = vld [vmem:[%s1938_s23 + $0x90] sm:$0xff]  ;;  %v1431_v13 = vld [vmem:[%s1938_s23 + $0x68] sm:$0xff]  ;;  %v1437_v15 = vld [vmem:[%s1938_s23 + $0x98] sm:$0xff] }
  0x12   : > { %v251_v11 = vpack.c.bf16 %v1436_v9, %v1435_v7  ;;  %v1432_v14 = vld [vmem:[%s1938_s23 + $0x70] sm:$0xff]  ;;  %v1969_v20 = vld [vmem:[%s1938_s23 + $0x19] sm:$0xff]  ;;  %v1972_v21 = vld [vmem:[%s1938_s23 + $0x21] sm:$0xff]  ;;  %v252_v23 = vpack.c.bf16 %v1437_v15, %v1437_v15 }
  0x13   : > { %1628 = vmatmul.mubr.msk.bf16.vlgmr.msra.gmra.mxu0 %vm255_vm2, %v248_v8  ;;  %v1957_v16 = vld [vmem:[%s1938_s23 + $0x9] sm:$0xff]  ;;  %v1960_v17 = vld [vmem:[%s1938_s23 + $0x11] sm:$0xff]  ;;  %v249_v19 = vpack.c.bf16 %v1432_v14, %v1431_v13  ;;  %v1981_v25 = vld [vmem:[%s1938_s23 + $0x39] sm:$0xff]  ;;  %v909_v27 = vpack.c.bf16 %v1972_v21, %v1969_v20 }
  0x14   : > { %1640 = vmatmul.mubr.msk.bf16.vlgmr.msra.gmra.mxu1 %vm255_vm2, %v251_v11  ;;  %1670 = vmatpush3.bf16.msra.mxu0 %v469_v10  ;;  %v908_v18 = vpack.c.bf16 %v1960_v17, %v1957_v16  ;;  %v1975_v22 = vld [vmem:[%s1938_s23 + $0x29] sm:$0xff]  ;;  %v1978_v24 = vld [vmem:[%s1938_s23 + $0x31] sm:$0xff]  ;;  %v1984_v26 = vld [vmem:[%s1938_s23 + $0x41] sm:$0xff]  ;;  %v447_v47 = vpack.c.bf16 %v1969_v20, %v1960_v17 }
  0x15   : > { %1648 = vmatpush3.bf16.msra.mxu1 %v363_v12  ;;  %1631 = vmatprep.mubr.msk.bf16.mxu0 %vm1878_vm1, %v1877_v1  ;;  %v910_v28 = vpack.c.bf16 %v1978_v24, %v1975_v22  ;;  %v911_v29 = vpack.c.bf16 %v1984_v26, %v1981_v25  ;;  %v1433_v30 = vld [vmem:[%s1938_s23 + $0x78] sm:$0xff]  ;;  %v1434_v31 = vld [vmem:[%s1938_s23 + $0x80] sm:$0xff]  ;;  %v224_v33 = vld [vmem:[%s1938_s23 + $0x8] sm:$0xff]  ;;  %v448_v51 = vpack.c.bf16 %v1975_v22, %v1972_v21 }
  0x16   : > { %1643 = vmatprep.mubr.msk.bf16.mxu1 %vm1878_vm1, %v1877_v1  ;;  %1691 = vmatprep.subr.bf16.mxu1 %v1877_v1  ;;  %v223_v32 = vld [vmem:[%s1938_s23] sm:$0xff]  ;;  %v250_v34 = vpack.c.bf16 %v1434_v31, %v1433_v30  ;;  %v225_v39 = vld [vmem:[%s1938_s23 + $0x10] sm:$0xff]  ;;  %v226_v40 = vld [vmem:[%s1938_s23 + $0x18] sm:$0xff]  ;;  %v449_v54 = vpack.c.bf16 %v1981_v25, %v1978_v24  ;;  %v450_v58 = vpack.c.bf16 %v1984_v26, %v1984_v26 }
  0x17   : > { %1713 = vmatprep.subr.bf16.mxu0 %v1877_v1  ;;  %v232_v36 = vpack.c.bf16 %v224_v33, %v223_v32  ;;  %v437_v38 = vld [vmem:[%s1938_s23 + $0x1] sm:$0xff]  ;;  %v233_v43 = vpack.c.bf16 %v226_v40, %v225_v39  ;;  %v229_v49 = vld [vmem:[%s1938_s23 + $0x30] sm:$0xff]  ;;  %v230_v50 = vld [vmem:[%s1938_s23 + $0x38] sm:$0xff] }
  0x18   : > { %v446_v42 = vpack.c.bf16 %v1957_v16, %v437_v38  ;;  %v227_v45 = vld [vmem:[%s1938_s23 + $0x20] sm:$0xff]  ;;  %v228_v46 = vld [vmem:[%s1938_s23 + $0x28] sm:$0xff]  ;;  %v235_v52 = vpack.c.bf16 %v230_v50, %v229_v49  ;;  %v1455_v56 = vld [vmem:[%s1938_s23 + $0xb0] sm:$0xff] }
  0x19   : > { %v234_v48 = vpack.c.bf16 %v228_v46, %v227_v45  ;;  %v231_v53 = vld [vmem:[%s1938_s23 + $0x40] sm:$0xff]  ;;  %v1456_v57 = vld [vmem:[%s1938_s23 + $0xb8] sm:$0xff]  ;;  %v1470_v62 = vld [vmem:[%s1938_s23 + $0x108] sm:$0xff] }
  0x1a   : > { %v236_v55 = vpack.c.bf16 %v231_v53, %v231_v53  ;;  %v562_v60 = vpack.c.bf16 %v1456_v57, %v1455_v56  ;;  %v1471_v63 = vld [vmem:[%s1938_s23 + $0x110] sm:$0xff]  ;;  %v1457_v0 = vld [vmem:[%s1938_s23 + $0xc0] sm:$0xff]  ;;  %v1458_v2 = vld [vmem:[%s1938_s23 + $0xc8] sm:$0xff] }
  0x1b   : > { %1632 = vmatmul.mubr.msk.bf16.gmra.mxu0 %vm255_vm2, %v249_v19  ;;  %v1500_v3 = vld [vmem:[%s2313_s1 + $0xc] sm:$0x3]  ;;  %v678_v4 = vpack.c.bf16 %v1471_v63, %v1470_v62  ;;  %v563_v5 = vpack.c.bf16 %v1458_v2, %v1457_v0  ;;  %v1472_v7 = vld [vmem:[%s1938_s23 + $0x118] sm:$0xff]  ;;  %v1473_v8 = vld [vmem:[%s1938_s23 + $0x120] sm:$0xff] }
  0x1c   : > { %1644 = vmatmul.mubr.msk.bf16.gmra.mxu1 %vm255_vm2, %v252_v23  ;;  %1635 = vmatprep.mubr.msk.bf16.mxu0 %vm1878_vm1, %v1877_v1  ;;  %v931_v6 = vsel %vm271_vm0, %v1500_v3, 0  ;;  %v1459_v9 = vld [vmem:[%s1938_s23 + $0xd0] sm:$0xff]  ;;  %v1460_v10 = vld [vmem:[%s1938_s23 + $0xd8] sm:$0xff]  ;;  %v679_v11 = vpack.c.bf16 %v1473_v8, %v1472_v7  ;;  %v1474_v13 = vld [vmem:[%s1938_s23 + $0x128] sm:$0xff] }
  0x1d   : > { %1649 = vmatprep.mubr.msk.bf16.mxu1 %vm1878_vm1, %v1877_v1  ;;  %v564_v12 = vpack.c.bf16 %v1460_v10, %v1459_v9  ;;  %v1475_v14 = vld [vmem:[%s1938_s23 + $0x130] sm:$0xff]  ;;  %v1461_v15 = vld [vmem:[%s1938_s23 + $0xe0] sm:$0xff]  ;;  %v1462_v19 = vld [vmem:[%s1938_s23 + $0xe8] sm:$0xff] }
  0x1e   : > { %v680_v23 = vpack.c.bf16 %v1475_v14, %v1474_v13  ;;  %v565_v30 = vpack.c.bf16 %v1462_v19, %v1461_v15  ;;  %v1476_v31 = vld [vmem:[%s1938_s23 + $0x138] sm:$0xff]  ;;  %v1477_v32 = vld [vmem:[%s1938_s23 + $0x140] sm:$0xff]  ;;  %v1463_v33 = vld [vmem:[%s1938_s23 + $0xf0] sm:$0xff] }
  0x1f   : > { %v566_v35 = vpack.c.bf16 %v1463_v33, %v1463_v33  ;;  %v1486_v38 = vld [vmem:[%s1938_s23 + $0xb9] sm:$0xff]  ;;  %v1515_v40 = vld [vmem:[%s2313_s1 + $0xe] sm:$0x3]  ;;  %v1521_v45 = vld [vmem:[%s2313_s1 + $0x10] sm:$0x3] }
  0x20   : > { %v1490_v49 = vld [vmem:[%s1938_s23 + $0xd9] sm:$0xff]  ;;  %v1491_v16 = vld [vmem:[%s1938_s23 + $0xe1] sm:$0xff]  ;;  %v1492_v17 = vld [vmem:[%s1938_s23 + $0xe9] sm:$0xff] }
  0x21   : > { %v1493_v20 = vld [vmem:[%s1938_s23 + $0xf1] sm:$0xff]  ;;  %v907_v22 = vld [vmem:[%s1938_s23 + $0x49] sm:$0xff]  ;;  %v1506_v24 = vld [vmem:[%s1938_s23 + $0x61] sm:$0xff] }
  0x22   : > { %v797_v21 = vpack.c.bf16 %v1493_v20, %v1493_v20  ;;  %v1129_v25 = vld [vmem:[%s1938_s23 + $0xa] sm:$0xff]  ;;  %v1130_v26 = vld [vmem:[%s1938_s23 + $0x12] sm:$0xff]  ;;  %v1132_v56 = vld [vmem:[%s1938_s23 + $0x22] sm:$0xff] }
  0x23   : > { %1636 = vmatmul.mubr.msk.bf16.gmra.mxu0 %vm255_vm2, %v250_v34  ;;  %v681_v34 = vpack.c.bf16 %v1477_v32, %v1476_v31  ;;  %v1138_v53 = vpack.c.bf16 %v1130_v26, %v1129_v25  ;;  %v1510_v57 = vld [vmem:[%s1938_s23 + $0x81] sm:$0xff]  ;;  %v1134_v62 = vld [vmem:[%s1938_s23 + $0x32] sm:$0xff]  ;;  %v1137_v9 = vld [vmem:[%s1938_s23 + $0x4a] sm:$0xff] }
  0x24   : > { %1650 = vmatmul.mubr.msk.bf16.vlgmr.msra.gmra.mxu1 %vm255_vm2, %v232_v36  ;;  %1671 = vmatprep.mubr.msk.bf16.mxu0 %vm1878_vm1, %v1877_v1  ;;  %v1478_v36 = vld [vmem:[%s1938_s23 + $0x148] sm:$0xff]  ;;  %v1512_v63 = vld [vmem:[%s1938_s23 + $0x91] sm:$0xff]  ;;  %v1513_v0 = vld [vmem:[%s1938_s23 + $0x99] sm:$0xff]  ;;  %v1142_v10 = vpack.c.bf16 %v1137_v9, %v1137_v9 }
  0x25   : > { %1692 = vmatpush3.bf16.msra.mxu1 %v585_v37  ;;  %1653 = vmatprep.mubr.msk.bf16.mxu1 %vm1878_vm1, %v1877_v1  ;;  %v1485_v37 = vld [vmem:[%s1938_s23 + $0xb1] sm:$0xff]  ;;  %v682_v39 = vpack.c.bf16 %v1478_v36, %v1478_v36  ;;  %v1026_v3 = vpack.c.bf16 %v1513_v0, %v1512_v63 }
  0x26   : > { %1735 = vmatprep.subr.bf16.mxu1 %v1877_v1  ;;  %v793_v41 = vpack.c.bf16 %v1486_v38, %v1485_v37 }
  0x2b   : > { %1672 = vmatmul.mubr.msk.bf16.vlgmr.msra.gmra.mxu0 %vm255_vm2, %v446_v42  ;;  %v1046_v42 = vsel %vm271_vm0, %v1515_v40, 0 }
  0x2c   : > { %1654 = vmatmul.mubr.msk.bf16.gmra.mxu1 %vm255_vm2, %v233_v43  ;;  %1714 = vmatpush3.bf16.msra.mxu0 %v701_v44  ;;  %v1487_v43 = vld [vmem:[%s1938_s23 + $0xc1] sm:$0xff]  ;;  %v1488_v44 = vld [vmem:[%s1938_s23 + $0xc9] sm:$0xff] }
  0x2d   : > { %1657 = vmatprep.mubr.msk.bf16.mxu1 %vm1878_vm1, %v1877_v1  ;;  %1675 = vmatprep.mubr.msk.bf16.mxu0 %vm1878_vm1, %v1877_v1  ;;  %v794_v46 = vpack.c.bf16 %v1488_v44, %v1487_v43 }
  0x2e   : > { %1757 = vmatprep.subr.bf16.mxu0 %v1877_v1 }
  0x33   : > { %1676 = vmatmul.mubr.msk.bf16.gmra.mxu0 %vm255_vm2, %v447_v47  ;;  %v1161_v47 = vsel %vm271_vm0, %v1521_v45, 0 }
  0x34   : > { %1658 = vmatmul.mubr.msk.bf16.gmra.mxu1 %vm255_vm2, %v234_v48  ;;  %1679 = vmatprep.mubr.msk.bf16.mxu0 %vm1878_vm1, %v1877_v1  ;;  %v1489_v48 = vld [vmem:[%s1938_s23 + $0xd1] sm:$0xff] }
  0x35   : > { %1661 = vmatprep.mubr.msk.bf16.mxu1 %vm1878_vm1, %v1877_v1  ;;  %v795_v50 = vpack.c.bf16 %v1490_v49, %v1489_v48 }
  0x3b   : > { %1680 = vmatmul.mubr.msk.bf16.gmra.mxu0 %vm255_vm2, %v448_v51 }
  0x3c   : > { %1662 = vmatmul.mubr.msk.bf16.gmra.mxu1 %vm255_vm2, %v235_v52  ;;  %1683 = vmatprep.mubr.msk.bf16.mxu0 %vm1878_vm1, %v1877_v1  ;;  %v1509_v52 = vld [vmem:[%s1938_s23 + $0x79] sm:$0xff] }
  0x3d   : > { %1665 = vmatprep.mubr.msk.bf16.mxu1 %vm1878_vm1, %v1877_v1 }
  0x43   : > { %1684 = vmatmul.mubr.msk.bf16.gmra.mxu0 %vm255_vm2, %v449_v54 }
  0x44   : > { %1666 = vmatmul.mubr.msk.bf16.gmra.mxu1 %vm255_vm2, %v236_v55  ;;  %1687 = vmatprep.mubr.msk.bf16.mxu0 %vm1878_vm1, %v1877_v1  ;;  %v1131_v55 = vld [vmem:[%s1938_s23 + $0x1a] sm:$0xff] }
  0x45   : > { %1693 = vmatprep.mubr.msk.bf16.mxu1 %vm1878_vm1, %v1877_v1  ;;  %v1139_v59 = vpack.c.bf16 %v1132_v56, %v1131_v55 }
  0x4b   : > { %1688 = vmatmul.mubr.msk.bf16.gmra.mxu0 %vm255_vm2, %v450_v58  ;;  %v1511_v58 = vld [vmem:[%s1938_s23 + $0x89] sm:$0xff] }
  0x4c   : > { %1694 = vmatmul.mubr.msk.bf16.vlgmr.msra.gmra.mxu1 %vm255_vm2, %v562_v60  ;;  %1715 = vmatprep.mubr.msk.bf16.mxu0 %vm1878_vm1, %v1877_v1  ;;  %v1025_v60 = vpack.c.bf16 %v1511_v58, %v1510_v57 }
  0x4d   : > { %1736 = vmatpush3.bf16.msra.mxu1 %v816_v61  ;;  %1697 = vmatprep.mubr.msk.bf16.mxu1 %vm1878_vm1, %v1877_v1  ;;  %v1133_v61 = vld [vmem:[%s1938_s23 + $0x2a] sm:$0xff] }
  0x4e   : > { %1779 = vmatprep.subr.bf16.mxu1 %v1877_v1  ;;  %v1140_v2 = vpack.c.bf16 %v1134_v62, %v1133_v61 }
  0x53   : > { %1716 = vmatmul.mubr.msk.bf16.vlgmr.msra.gmra.mxu0 %vm255_vm2, %v678_v4  ;;  %v1135_v4 = vld [vmem:[%s1938_s23 + $0x3a] sm:$0xff] }
  0x54   : > { %1698 = vmatmul.mubr.msk.bf16.gmra.mxu1 %vm255_vm2, %v563_v5  ;;  %1758 = vmatpush3.bf16.msra.mxu0 %v931_v6  ;;  %v1136_v5 = vld [vmem:[%s1938_s23 + $0x42] sm:$0xff] }
  0x55   : > { %1701 = vmatprep.mubr.msk.bf16.mxu1 %vm1878_vm1, %v1877_v1  ;;  %1719 = vmatprep.mubr.msk.bf16.mxu0 %vm1878_vm1, %v1877_v1  ;;  %v1514_v6 = vld [vmem:[%s1938_s23 + $0xa1] sm:$0xff]  ;;  %v1141_v7 = vpack.c.bf16 %v1136_v5, %v1135_v4 }
  0x56   : > { %1801 = vmatprep.subr.bf16.mxu0 %v1877_v1  ;;  %v1027_v8 = vpack.c.bf16 %v1514_v6, %v1514_v6 }
  0x5b   : > { %1720 = vmatmul.mubr.msk.bf16.gmra.mxu0 %vm255_vm2, %v679_v11 }
  0x5c   : > { %1702 = vmatmul.mubr.msk.bf16.gmra.mxu1 %vm255_vm2, %v564_v12  ;;  %1723 = vmatprep.mubr.msk.bf16.mxu0 %vm1878_vm1, %v1877_v1 }
  0x5d   : > { %1705 = vmatprep.mubr.msk.bf16.mxu1 %vm1878_vm1, %v1877_v1 }
  0x63   : > { %1724 = vmatmul.mubr.msk.bf16.gmra.mxu0 %vm255_vm2, %v680_v23 }
  0x64   : > { %1706 = vmatmul.mubr.msk.bf16.gmra.mxu1 %vm255_vm2, %v565_v30  ;;  %1727 = vmatprep.mubr.msk.bf16.mxu0 %vm1878_vm1, %v1877_v1 }
  0x65   : > { %1709 = vmatprep.mubr.msk.bf16.mxu1 %vm1878_vm1, %v1877_v1 }
  0x6b   : > { %1728 = vmatmul.mubr.msk.bf16.gmra.mxu0 %vm255_vm2, %v681_v34 }
  0x6c   : > { %1710 = vmatmul.mubr.msk.bf16.gmra.mxu1 %vm255_vm2, %v566_v35  ;;  %1731 = vmatprep.mubr.msk.bf16.mxu0 %vm1878_vm1, %v1877_v1 }
  0x6d   : > { %1737 = vmatprep.mubr.msk.bf16.mxu1 %vm1878_vm1, %v1877_v1 }
  0x73   : > { %1732 = vmatmul.mubr.msk.bf16.gmra.mxu0 %vm255_vm2, %v682_v39 }
  0x74   : > { %1738 = vmatmul.mubr.msk.bf16.vlgmr.msra.gmra.mxu1 %vm255_vm2, %v793_v41  ;;  %1759 = vmatprep.mubr.msk.bf16.mxu0 %vm1878_vm1, %v1877_v1 }
  0x75   : > { %1780 = vmatpush3.bf16.msra.mxu1 %v1046_v42  ;;  %1741 = vmatprep.mubr.msk.bf16.mxu1 %vm1878_vm1, %v1877_v1 }
  0x7b   : > { %1760 = vmatmul.mubr.msk.bf16.vlgmr.msra.gmra.mxu0 %vm255_vm2, %v908_v18  ;;  %v796_v18 = vpack.c.bf16 %v1492_v17, %v1491_v16 }
  0x7c   : > { %1742 = vmatmul.mubr.msk.bf16.gmra.mxu1 %vm255_vm2, %v794_v46  ;;  %1802 = vmatpush3.bf16.msra.mxu0 %v1161_v47 }
  0x7d   : > { %1745 = vmatprep.mubr.msk.bf16.mxu1 %vm1878_vm1, %v1877_v1  ;;  %1763 = vmatprep.mubr.msk.bf16.mxu0 %vm1878_vm1, %v1877_v1 }
  0x83   : > { %1764 = vmatmul.mubr.msk.bf16.gmra.mxu0 %vm255_vm2, %v909_v27  ;;  %v1507_v27 = vld [vmem:[%s1938_s23 + $0x69] sm:$0xff] }
  0x84   : > { %1746 = vmatmul.mubr.msk.bf16.gmra.mxu1 %vm255_vm2, %v795_v50  ;;  %1767 = vmatprep.mubr.msk.bf16.mxu0 %vm1878_vm1, %v1877_v1  ;;  %v1023_v51 = vpack.c.bf16 %v1507_v27, %v1506_v24 }
  0x85   : > { %1749 = vmatprep.mubr.msk.bf16.mxu1 %vm1878_vm1, %v1877_v1 }
  0x8b   : > { %1768 = vmatmul.mubr.msk.bf16.gmra.mxu0 %vm255_vm2, %v910_v28  ;;  %v912_v28 = vpack.c.bf16 %v907_v22, %v907_v22 }
  0x8c   : > { %1750 = vmatmul.mubr.msk.bf16.gmra.mxu1 %vm255_vm2, %v796_v18  ;;  %1771 = vmatprep.mubr.msk.bf16.mxu0 %vm1878_vm1, %v1877_v1 }
  0x8d   : > { %1753 = vmatprep.mubr.msk.bf16.mxu1 %vm1878_vm1, %v1877_v1 }
  0x93   : > { %1772 = vmatmul.mubr.msk.bf16.gmra.mxu0 %vm255_vm2, %v911_v29  ;;  %v1508_v29 = vld [vmem:[%s1938_s23 + $0x71] sm:$0xff] }
  0x94   : > { %1754 = vmatmul.mubr.msk.bf16.gmra.mxu1 %vm255_vm2, %v797_v21  ;;  %1775 = vmatprep.mubr.msk.bf16.mxu0 %vm1878_vm1, %v1877_v1  ;;  %v1024_v54 = vpack.c.bf16 %v1509_v52, %v1508_v29 }
  0x95   : > { %1781 = vmatprep.mubr.msk.bf16.mxu1 %vm1878_vm1, %v1877_v1 }
  0x9b   : > { %1776 = vmatmul.mubr.msk.bf16.gmra.mxu0 %vm255_vm2, %v912_v28 }
  0x9c   : > { %1782 = vmatmul.mubr.msk.bf16.vlgmr.msra.gmra.mxu1 %vm255_vm2, %v1023_v51  ;;  %1803 = vmatprep.mubr.msk.bf16.mxu0 %vm1878_vm1, %v1877_v1 }
  0x9d   : > { %1785 = vmatprep.mubr.msk.bf16.mxu1 %vm1878_vm1, %v1877_v1 }
  0xa3   : > { %1804 = vmatmul.mubr.msk.bf16.vlgmr.msra.gmra.mxu0 %vm255_vm2, %v1138_v53 }
  0xa4   : > { %1786 = vmatmul.mubr.msk.bf16.gmra.mxu1 %vm255_vm2, %v1024_v54  ;;  %1807 = vmatprep.mubr.msk.bf16.mxu0 %vm1878_vm1, %v1877_v1 }
  0xa5   : > { %1789 = vmatprep.mubr.msk.bf16.mxu1 %vm1878_vm1, %v1877_v1 }
  0xab   : > { %1808 = vmatmul.mubr.msk.bf16.gmra.mxu0 %vm255_vm2, %v1139_v59 }
  0xac   : > { %1790 = vmatmul.mubr.msk.bf16.gmra.mxu1 %vm255_vm2, %v1025_v60  ;;  %1811 = vmatprep.mubr.msk.bf16.mxu0 %vm1878_vm1, %v1877_v1 }
  0xad   : > { %1793 = vmatprep.mubr.msk.bf16.mxu1 %vm1878_vm1, %v1877_v1 }
  0xb3   : > { %1812 = vmatmul.mubr.msk.bf16.gmra.mxu0 %vm255_vm2, %v1140_v2 }
  0xb4   : > { %1794 = vmatmul.mubr.msk.bf16.gmra.mxu1 %vm255_vm2, %v1026_v3  ;;  %1815 = vmatprep.mubr.msk.bf16.mxu0 %vm1878_vm1, %v1877_v1 }
  0xb5   : > { %1797 = vmatprep.mubr.msk.bf16.mxu1 %vm1878_vm1, %v1877_v1 }
  0xbb   : > { %1816 = vmatmul.mubr.msk.bf16.gmra.mxu0 %vm255_vm2, %v1141_v7 }
  0xbc   : > { %1798 = vmatmul.mubr.msk.bf16.gmra.mxu1 %vm255_vm2, %v1027_v8  ;;  %1819 = vmatprep.mubr.msk.bf16.mxu0 %vm1878_vm1, %v1877_v1 }
  0xc3   : > { %1820 = vmatmul.mubr.msk.bf16.gmra.mxu0 %vm255_vm2, %v1142_v10 }
  0xd3   : > { %v309_v11 = vpop.f32.mrf.mxu0 }
  0xd4   : > { %v333_v12 = vpop.f32.mrf.mxu1 }
  0xd5   : > { %v1629_v13 = vpop.f32.mrf.mxu0 }
  0xd6   : > { %v1641_v14 = vpop.f32.mrf.mxu1 }
  0xd7   : > { %v312_v15 = vpop.f32.mrf.mxu0 }
  0xd8   : > { %v336_v19 = vpop.f32.mrf.mxu1 }
  0xd9   : > { %v1630_v23 = vpop.f32.mrf.mxu0 }
  0xda   : > { %v1642_v30 = vpop.f32.mrf.mxu1 }
  0xdb   : > { %v317_v31 = vpop.f32.mrf.mxu0 }
  0xdc   : > { %v341_v32 = vpop.f32.mrf.mxu1 }
  0xdd   : > { %v1633_v33 = vpop.f32.mrf.mxu0 }
  0xde   : > { %v1645_v34 = vpop.f32.mrf.mxu1 }
  0xdf   : > { %v320_v35 = vpop.f32.mrf.mxu0 }
  0xe0   : > { %v344_v36 = vpop.f32.mrf.mxu1 }
  0xe1   : > { %v1634_v37 = vpop.f32.mrf.mxu0 }
  0xe2   : > { %v1646_v1 = vpop.f32.mrf.mxu1 }
  0xe3   : > { %v325_v38 = vpop.f32.mrf.mxu0 }
  0xe4   : > { %v399_v39 = vpop.f32.mrf.mxu1 }
  0xe5   : > { %v400_v40 = vadd.f32 %v399_v39, %v309_v11  ;;  %v1637_v41 = vpop.f32.mrf.mxu0 }
  0xe6   : > { %v1651_v42 = vpop.f32.mrf.mxu1 }
  0xe7   : > { %v328_v43 = vpop.f32.mrf.mxu0 }
  0xe8   : > { %v402_v44 = vpop.f32.mrf.mxu1 }
  0xe9   : > { %v403_v45 = vadd.f32 %v402_v44, %v312_v15  ;;  %v1638_v46 = vpop.f32.mrf.mxu0 }
  0xea   : > { %v1652_v47 = vpop.f32.mrf.mxu1 }
  0xeb   : > { %v505_v48 = vpop.f32.mrf.mxu0 }
  0xec   : > { %v407_v49 = vpop.f32.mrf.mxu1  ;;  %v543_v50 = vadd.f32 %v505_v48, %v400_v40 }
  0xed   : > { %v408_v16 = vadd.f32 %v407_v49, %v317_v31  ;;  %v1673_v17 = vpop.f32.mrf.mxu0 }
  0xee   : > { %v1655_v18 = vpop.f32.mrf.mxu1 }
  0xef   : > { %v508_v20 = vpop.f32.mrf.mxu0 }
  0xf0   : > { %v410_v21 = vpop.f32.mrf.mxu1  ;;  %v544_v22 = vadd.f32 %v508_v20, %v403_v45 }
  0xf1   : > { %v411_v24 = vadd.f32 %v410_v21, %v320_v35  ;;  %v1674_v27 = vpop.f32.mrf.mxu0 }
  0xf2   : > { %v1656_v28 = vpop.f32.mrf.mxu1 }
  0xf3   : > { %v513_v51 = vpop.f32.mrf.mxu0 }
  0xf4   : > { %v415_v25 = vpop.f32.mrf.mxu1  ;;  %v545_v26 = vadd.f32 %v513_v51, %v408_v16 }
  0xf5   : > { %v416_v29 = vadd.f32 %v415_v25, %v325_v38  ;;  %v1677_v52 = vpop.f32.mrf.mxu0 }
  0xf6   : > { %v1659_v53 = vpop.f32.mrf.mxu1 }
  0xf7   : > { %v516_v54 = vpop.f32.mrf.mxu0 }
  0xf8   : > { %v418_v55 = vpop.f32.mrf.mxu1  ;;  %v546_v56 = vadd.f32 %v516_v54, %v411_v24 }
  0xf9   : > { %v419_v57 = vadd.f32 %v418_v55, %v328_v43  ;;  %v1678_v58 = vpop.f32.mrf.mxu0 }
  0xfa   : > { %v1660_v59 = vpop.f32.mrf.mxu1 }
  0xfb   : > { %v521_v60 = vpop.f32.mrf.mxu0 }
  0xfc   : > { %v423_v61 = vpop.f32.mrf.mxu1  ;;  %v547_v62 = vadd.f32 %v521_v60, %v416_v29 }
  0xfd   : > { %v424_v63 = vadd.f32 %v423_v61, %v333_v12  ;;  %v1681_v0 = vpop.f32.mrf.mxu0 }
  0xfe   : > { %v1663_v2 = vpop.f32.mrf.mxu1 }
  0xff   : > { %v524_v3 = vpop.f32.mrf.mxu0 }
 0x100   : > { %v426_v4 = vpop.f32.mrf.mxu1  ;;  %v548_v5 = vadd.f32 %v524_v3, %v419_v57 }
 0x101   : > { %v427_v6 = vadd.f32 %v426_v4, %v336_v19  ;;  %v1682_v7 = vpop.f32.mrf.mxu0 }
 0x102   : > { %v1664_v8 = vpop.f32.mrf.mxu1 }
 0x103   : > { %v529_v9 = vpop.f32.mrf.mxu0 }
 0x104   : > { %v431_v10 = vpop.f32.mrf.mxu1  ;;  %v549_v11 = vadd.f32 %v529_v9, %v424_v63 }
 0x105   : > { %v432_v13 = vadd.f32 %v431_v10, %v341_v32  ;;  %v1685_v14 = vpop.f32.mrf.mxu0 }
 0x106   : > { %v1667_v15 = vpop.f32.mrf.mxu1 }
 0x107   : > { %v532_v23 = vpop.f32.mrf.mxu0 }
 0x108   : > { %v434_v30 = vpop.f32.mrf.mxu1  ;;  %v550_v31 = vadd.f32 %v532_v23, %v427_v6 }
 0x109   : > { %v1686_v33 = vpop.f32.mrf.mxu0 }
 0x10a   : > { %v1668_v34 = vpop.f32.mrf.mxu1 }
 0x10b   : > { %v537_v12 = vpop.f32.mrf.mxu0 }
 0x10c   : > { %v551_v35 = vadd.f32 %v537_v12, %v432_v13  ;;  %v621_v36 = vpop.f32.mrf.mxu1 }
 0x10d   : > { %v659_v37 = vadd.f32 %v621_v36, %v543_v50  ;;  %v1689_v1 = vpop.f32.mrf.mxu0 }
 0x10e   : > { %v1695_v38 = vpop.f32.mrf.mxu1 }
 0x10f   : > { %v540_v19 = vpop.f32.mrf.mxu0 }
 0x110   : > { %v624_v39 = vpop.f32.mrf.mxu1 }
 0x111   : > { %v660_v40 = vadd.f32 %v624_v39, %v544_v22  ;;  %v1690_v41 = vpop.f32.mrf.mxu0 }
 0x112   : > { %v1696_v42 = vpop.f32.mrf.mxu1 }
 0x113   : > { %v737_v43 = vpop.f32.mrf.mxu0 }
 0x114   : > { %v629_v32 = vpop.f32.mrf.mxu1  ;;  %v2224_v44 = vadd.f32 %v737_v43, %v659_v37 }
 0x115   : > { %v661_v45 = vadd.f32 %v629_v32, %v545_v26  ;;  %v1717_v46 = vpop.f32.mrf.mxu0 }
 0x116   : > { %v1699_v47 = vpop.f32.mrf.mxu1 }
 0x117   : > { %v740_v48 = vpop.f32.mrf.mxu0 }
 0x118   : > { %v632_v49 = vpop.f32.mrf.mxu1  ;;  %v2226_v16 = vadd.f32 %v740_v48, %v660_v40 }
 0x119   : > { %v662_v17 = vadd.f32 %v632_v49, %v546_v56  ;;  %v1718_v50 = vpop.f32.mrf.mxu0 }
 0x11a   : > { %v1700_v18 = vpop.f32.mrf.mxu1 }
 0x11b   : > { %v745_v20 = vpop.f32.mrf.mxu0 }
 0x11c   : > { %v637_v21 = vpop.f32.mrf.mxu1  ;;  %v2228_v24 = vadd.f32 %v745_v20, %v661_v45 }
 0x11d   : > { %v663_v22 = vadd.f32 %v637_v21, %v547_v62  ;;  %v1721_v27 = vpop.f32.mrf.mxu0 }
 0x11e   : > { %v1703_v28 = vpop.f32.mrf.mxu1 }
 0x11f   : > { %v748_v51 = vpop.f32.mrf.mxu0 }
 0x120   : > { %v640_v25 = vpop.f32.mrf.mxu1  ;;  %v2230_v29 = vadd.f32 %v748_v51, %v662_v17 }
 0x121   : > { %v664_v26 = vadd.f32 %v640_v25, %v548_v5  ;;  %v1722_v52 = vpop.f32.mrf.mxu0 }
 0x122   : > { %v1704_v53 = vpop.f32.mrf.mxu1 }
 0x123   : > { %v753_v54 = vpop.f32.mrf.mxu0 }
 0x124   : > { %v645_v55 = vpop.f32.mrf.mxu1  ;;  %v2232_v57 = vadd.f32 %v753_v54, %v663_v22 }
 0x125   : > { %v665_v56 = vadd.f32 %v645_v55, %v549_v11  ;;  %v1725_v58 = vpop.f32.mrf.mxu0 }
 0x126   : > { %v1707_v59 = vpop.f32.mrf.mxu1 }
 0x127   : > { %v756_v60 = vpop.f32.mrf.mxu0 }
 0x128   : > { %v648_v61 = vpop.f32.mrf.mxu1  ;;  %v2234_v63 = vadd.f32 %v756_v60, %v664_v26 }
 0x129   : > { %v666_v62 = vadd.f32 %v648_v61, %v550_v31  ;;  %v1726_v0 = vpop.f32.mrf.mxu0 }
 0x12a   : > { %v1708_v2 = vpop.f32.mrf.mxu1 }
 0x12b   : > { %v761_v3 = vpop.f32.mrf.mxu0 }
 0x12c   : > { %v653_v4 = vpop.f32.mrf.mxu1  ;;  %v2236_v6 = vadd.f32 %v761_v3, %v665_v56 }
 0x12d   : > { %v667_v5 = vadd.f32 %v653_v4, %v551_v35  ;;  %v1729_v7 = vpop.f32.mrf.mxu0 }
 0x12e   : > { %v1711_v8 = vpop.f32.mrf.mxu1 }
 0x12f   : > { %v764_v9 = vpop.f32.mrf.mxu0 }
 0x130   : > { %v656_v10 = vpop.f32.mrf.mxu1  ;;  %v2238_v13 = vadd.f32 %v764_v9, %v666_v62 }
 0x131   : > { %v1730_v11 = vpop.f32.mrf.mxu0 }
 0x132   : > { %v1712_v14 = vpop.f32.mrf.mxu1 }
 0x133   : > { %v769_v15 = vpop.f32.mrf.mxu0 }
 0x134   : > { %v2240_v23 = vadd.f32 %v769_v15, %v667_v5  ;;  %v852_v30 = vpop.f32.mrf.mxu1 }
 0x135   : > { %v1733_v31 = vpop.f32.mrf.mxu0  ;;  %v890_v62 = vadd.f32 %v852_v30, %v2224_v44 }
 0x136   : > { %v1739_v33 = vpop.f32.mrf.mxu1  ;;  %v2265_v31 = vld [vmem:[%s2314_s2] ss:$0 sm:$0xff] }
 0x137   : > { %v772_v34 = vpop.f32.mrf.mxu0 }
 0x138   : > { %v855_v12 = vpop.f32.mrf.mxu1 }
 0x139   : > { %v1734_v36 = vpop.f32.mrf.mxu0  ;;  %v891_v7 = vadd.f32 %v855_v12, %v2226_v16 }
 0x13a   : > { %v1740_v37 = vpop.f32.mrf.mxu1 }
 0x13b   : > { %v967_v1 = vpop.f32.mrf.mxu0 }
 0x13c   : > { %v860_v35 = vpop.f32.mrf.mxu1  ;;  %v1005_v3 = vadd.f32 %v967_v1, %v890_v62 }
 0x13d   : > { %v1761_v38 = vpop.f32.mrf.mxu0  ;;  %v892_v30 = vadd.f32 %v860_v35, %v2228_v24 }
 0x13e   : > { %v1743_v19 = vpop.f32.mrf.mxu1 }
 0x13f   : > { %v970_v39 = vpop.f32.mrf.mxu0 }
 0x140   : > { %v863_v40 = vpop.f32.mrf.mxu1  ;;  %v1006_v11 = vadd.f32 %v970_v39, %v891_v7 }
 0x141   : > { %v1762_v41 = vpop.f32.mrf.mxu0  ;;  %v893_v19 = vadd.f32 %v863_v40, %v2230_v29 }
 0x142   : > { %v1744_v42 = vpop.f32.mrf.mxu1 }
 0x143   : > { %v975_v43 = vpop.f32.mrf.mxu0 }
 0x144   : > { %v2242_v32 = vpop.f32.mrf.mxu1  ;;  %v1007_v37 = vadd.f32 %v975_v43, %v892_v30 }
 0x145   : > { %v1765_v45 = vpop.f32.mrf.mxu0  ;;  %v894_v29 = vadd.f32 %v2242_v32, %v2232_v57 }
 0x146   : > { %v1747_v46 = vpop.f32.mrf.mxu1 }
 0x147   : > { %v978_v47 = vpop.f32.mrf.mxu0 }
 0x148   : > { %v2244_v48 = vpop.f32.mrf.mxu1  ;;  %v1008_v46 = vadd.f32 %v978_v47, %v893_v19 }
 0x149   : > { %v1766_v49 = vpop.f32.mrf.mxu0 }
 0x14a   : > { %v1748_v17 = vpop.f32.mrf.mxu1 }
 0x14b   : > { %v983_v50 = vpop.f32.mrf.mxu0 }
 0x14c   : > { %v2246_v18 = vpop.f32.mrf.mxu1 }
 0x14d   : > { %v1769_v20 = vpop.f32.mrf.mxu0 }
 0x14e   : > { %v1751_v21 = vpop.f32.mrf.mxu1 }
 0x14f   : > { %v2248_v22 = vpop.f32.mrf.mxu0 }
 0x150   : > { %v2250_v27 = vpop.f32.mrf.mxu1 }
 0x151   : > { %v1770_v28 = vpop.f32.mrf.mxu0 }
 0x152   : > { %v1752_v51 = vpop.f32.mrf.mxu1 }
 0x153   : > { %v2252_v25 = vpop.f32.mrf.mxu0  ;;  %v1009_v51 = vadd.f32 %v983_v50, %v894_v29 }
 0x154   : > { %v2254_v26 = vpop.f32.mrf.mxu1 }
 0x155   : > { %v1773_v52 = vpop.f32.mrf.mxu0 }
 0x156   : > { %v1755_v53 = vpop.f32.mrf.mxu1 }
 0x157   : > { %v2256_v54 = vpop.f32.mrf.mxu0 }
 0x158   : > { %v887_v55 = vpop.f32.mrf.mxu1 }
 0x159   : > { %v1774_v56 = vpop.f32.mrf.mxu0 }
 0x15a   : > { %v1756_v58 = vpop.f32.mrf.mxu1  ;;  %v895_v56 = vadd.f32 %v2244_v48, %v2234_v63 }
 0x15b   : > { %v2258_v59 = vpop.f32.mrf.mxu0 }
 0x15c   : > { %v1082_v60 = vpop.f32.mrf.mxu1  ;;  %v1010_v32 = vadd.f32 %v2248_v22, %v895_v56 }
 0x15d   : > { %v1777_v61 = vpop.f32.mrf.mxu0  ;;  %v1120_v8 = vadd.f32 %v1082_v60, %v1005_v3 }
 0x15e   : > { %v1783_v0 = vpop.f32.mrf.mxu1 }
 0x15f   : > { %v1002_v2 = vpop.f32.mrf.mxu0 }
 0x160   : > { %v1085_v4 = vpop.f32.mrf.mxu1 }
 0x161   : > { %v1778_v5 = vpop.f32.mrf.mxu0  ;;  %v1121_v33 = vadd.f32 %v1085_v4, %v1006_v11  ;;  %v896_v4 = vadd.f32 %v2246_v18, %v2236_v6 }
 0x162   : > { %v1784_v9 = vpop.f32.mrf.mxu1 }
 0x163   : > { %v1197_v10 = vpop.f32.mrf.mxu0  ;;  %v1011_v48 = vadd.f32 %v2252_v25, %v896_v4 }
 0x164   : > { %v1090_v14 = vpop.f32.mrf.mxu1  ;;  %v1235_v15 = vadd.f32 %v1197_v10, %v1120_v8 }
 0x165   : > { %v1805_v44 = vpop.f32.mrf.mxu0  ;;  %v1122_v39 = vadd.f32 %v1090_v14, %v1007_v37  ;;  %v897_v14 = vadd.f32 %v2250_v27, %v2238_v13 }
 0x166   : > { %v1787_v34 = vpop.f32.mrf.mxu1  ;;  %v1251_v16 = vadd.f32 %v2265_v31, %v1235_v15 }
 0x167   : > { %v1200_v36 = vpop.f32.mrf.mxu0  ;;  %v1012_v30 = vadd.f32 %v2256_v54, %v897_v14 }
 0x168   : > { %v1093_v12 = vpop.f32.mrf.mxu1  ;;  %v1236_v1 = vadd.f32 %v1200_v36, %v1121_v33  ;;  %v1260_v49 = vmax.f32 %v1251_v16, 0.0  ;;  %v898_v16 = vadd.f32 %v2254_v26, %v2240_v23 }
 0x169   : > { %v1806_v38 = vpop.f32.mrf.mxu0  ;;  %v1123_v40 = vadd.f32 %v1093_v12, %v1008_v46 }
 0x16a   : > { %v1252_v41 = vadd.f32 %v2265_v31, %v1236_v1  ;;  %v1788_v42 = vpop.f32.mrf.mxu1  ;;  %v1013_v27 = vadd.f32 %v2258_v59, %v898_v16 }
 0x16b   : > { %v1205_v45 = vpop.f32.mrf.mxu0 }
 0x16c   : > { %v1261_v24 = vmax.f32 %v1252_v41, 0.0  ;;  %v1098_v35 = vpop.f32.mrf.mxu1  ;;  %v1237_v17 = vadd.f32 %v1205_v45, %v1122_v39 }
 0x16d   : > { %v1809_v43 = vpop.f32.mrf.mxu0  ;;  %v1124_v58 = vadd.f32 %v1098_v35, %v1009_v51 }
 0x16e   : > { %v1551_v20 = vpack.c.bf16 %v1261_v24, %v1260_v49  ;;  %v1791_v21 = vpop.f32.mrf.mxu1  ;;  %v1253_v47 = vadd.f32 %v2265_v31, %v1237_v17 }
 0x16f   : > { %v1208_v28 = vpop.f32.mrf.mxu0 }
 0x170   : > { %1552 = vst [vmem:[%s2275_s20] sm:$0xff] %v1551_v20   ;;  %v1101_v52 = vpop.f32.mrf.mxu1  ;;  %v1238_v53 = vadd.f32 %v1208_v28, %v1123_v40  ;;  %v1262_v62 = vmax.f32 %v1253_v47, 0.0 }
 0x171   : > { %v1810_v55 = vpop.f32.mrf.mxu0  ;;  %v1125_v5 = vadd.f32 %v1101_v52, %v1010_v32 }
 0x172   : > { %v1254_v60 = vadd.f32 %v2265_v31, %v1238_v53  ;;  %v1792_v61 = vpop.f32.mrf.mxu1 }
 0x173   : > { %v1213_v57 = vpop.f32.mrf.mxu0 }
 0x174   : > { %v1263_v0 = vmax.f32 %v1254_v60, 0.0  ;;  %v1106_v50 = vpop.f32.mrf.mxu1  ;;  %v1239_v2 = vadd.f32 %v1213_v57, %v1124_v58 }
 0x175   : > { %v1813_v3 = vpop.f32.mrf.mxu0  ;;  %v1126_v15 = vadd.f32 %v1106_v50, %v1011_v48 }
 0x176   : > { %v1556_v7 = vpack.c.bf16 %v1263_v0, %v1262_v62  ;;  %v1795_v8 = vpop.f32.mrf.mxu1  ;;  %v1255_v9 = vadd.f32 %v2265_v31, %v1239_v2 }
 0x177   : > { %v1216_v63 = vpop.f32.mrf.mxu0 }
 0x178   : > { %1568 = vst [vmem:[%s2275_s20 + $0x8] sm:$0xff] %v1556_v7   ;;  %v1109_v10 = vpop.f32.mrf.mxu1  ;;  %v1240_v11 = vadd.f32 %v1216_v63, %v1125_v5  ;;  %v1264_v33 = vmax.f32 %v1255_v9, 0.0 }
 0x179   : > { %v1814_v22 = vpop.f32.mrf.mxu0  ;;  %v1127_v12 = vadd.f32 %v1109_v10, %v1012_v30 }
 0x17a   : > { %v1256_v44 = vadd.f32 %v2265_v31, %v1240_v11  ;;  %v1796_v6 = vpop.f32.mrf.mxu1 }
 0x17b   : > { %v1221_v18 = vpop.f32.mrf.mxu0 }
 0x17c   : > { %v1265_v34 = vmax.f32 %v1256_v44, 0.0  ;;  %v1114_v25 = vpop.f32.mrf.mxu1  ;;  %v1241_v36 = vadd.f32 %v1221_v18, %v1126_v15 }
 0x17d   : > { %v1817_v37 = vpop.f32.mrf.mxu0  ;;  %v1128_v42 = vadd.f32 %v1114_v25, %v1013_v27 }
 0x17e   : > { %v1561_v1 = vpack.c.bf16 %v1265_v34, %v1264_v33  ;;  %v1799_v38 = vpop.f32.mrf.mxu1  ;;  %v1257_v19 = vadd.f32 %v2265_v31, %v1241_v36 }
 0x17f   : > { %v1224_v13 = vpop.f32.mrf.mxu0 }
 0x180   : > { %1569 = vst [vmem:[%s2275_s20 + $0x10] sm:$0xff] %v1561_v1   ;;  %v1117_v39 = vpop.f32.mrf.mxu1  ;;  %v1242_v54 = vadd.f32 %v1224_v13, %v1127_v12  ;;  %v1266_v23 = vmax.f32 %v1257_v19, 0.0 }
 0x181   : > { %v1818_v41 = vpop.f32.mrf.mxu0 }
 0x182   : > { %v1258_v45 = vadd.f32 %v2265_v31, %v1242_v54  ;;  %v1800_v46 = vpop.f32.mrf.mxu1 }
 0x183   : > { %v1229_v49 = vpop.f32.mrf.mxu0 }
 0x184   : > { %v1267_v26 = vmax.f32 %v1258_v45, 0.0  ;;  %v1243_v24 = vadd.f32 %v1229_v49, %v1128_v42 }
 0x185   : > { %v1821_v35 = vpop.f32.mrf.mxu0 }
 0x186   : > { %v1566_v17 = vpack.c.bf16 %v1267_v26, %v1266_v23  ;;  %v1259_v59 = vadd.f32 %v2265_v31, %v1243_v24 }
 0x187   : > { %v1232_v43 = vpop.f32.mrf.mxu0 }
 0x188   : > { %1570 = vst [vmem:[%s2275_s20 + $0x18] sm:$0xff] %v1566_v17   ;;  %v1268_v29 = vmax.f32 %v1259_v59, 0.0 }
 0x189   : > { %v1822_v40 = vpop.f32.mrf.mxu0 }
 0x18a   : > { %v1547_v20 = vpack.c.bf16 %v1268_v29, %v1268_v29 }
 0x18c   : > { %1314 = vst [vmem:[%s2275_s20 + $0x20] sm:$0xf] %v1547_v20 }
 0x18d PF: > { %s13_s14 = sadd.s32 1, %s1875_s14   ;;  %s2316_s12 = smov %s1871_s13 }
 0x18e   : > { %p10_p5 = scmp.ge.s32.totalorder %s13_s14, 4   ;;  %s2317_s13 = smov %s2319_s15 }
 0x190   :  { %12 = sbr.rel (!%p10_p5) target bundleno = 2 (0x2), region = 79 }

// kernel: _lambda_.5
= control target key start
LH: loop header
LB: loop body
LE: loop exit
PB: predicated region body
PF: predicated region fallthrough
CT: control target
= control target key end

     0   :  { %s2818_s15 = smov 0   ;;  %s2820_s16 = smov 0   ;;  %s3447_s0 = inlined_call_operand.vmem [shape: f32[2,1,104,128], index: 0, kind: input, shape index: {}]   ;;  %s3448_s1 = inlined_call_operand.vmem [shape: bf16[9,128,128], index: 1, kind: input, shape index: {}]   ;;  %s3449_s2 = inlined_call_operand.vmem [shape: f32[1,128], index: 2, kind: input, shape index: {}]   ;;  %s3450_s3 = inlined_call_operand.vmem [shape: f32[2,80,128], index: 3, kind: input, shape index: {}]   ;;  %s3451_s4 = inlined_call_operand.vmem [shape: bf16[2,80,128], index: 4, kind: output, shape index: {}]  }
   0x1   :  { %s2822_s17 = smov 0  }
   0x2 LB: > { %s26_s18 = sadd.s32 1, %s2785_s16  ;;  %p1953_p0 = scmp.ge.s32.totalorder %s2789_s17, 1  ;;  %s2789_s17 = sphi %s2822_s17, %s14_s17   ;;  %s2785_s16 = sphi %s2820_s16, %s3453_s16   ;;  %s2781_s15 = sphi %s2818_s15, %s3452_s15  }
   0x3   : > { %p28_p1 = scmp.ge.s32.totalorder %s26_s18, 2  ;;  %p208_p2 = scmp.lt.s32.totalorder %s2789_s17, 3 }
   0x5   : > { %s3455_s18 = smov (%p28_p1, %s26_s18), 0  ;;  %p209_p3 = pnand %p1953_p0, %p208_p2 }
   0x6   : > { %p252_p4 = scmp.lt.s32.totalorder (!%p209_p3), %s2781_s15, 1 }
   0x7   : > { %212 = sbr.rel (%p209_p3) target bundleno = 429 (0x1ad), region = 36 }
   0xc   : > { %v2695_v0 = vld [vmem:[%s3448_s1 + $0x78] sm:$0xff]   ;;  %v2791_v1 = vmov 0.0   ;;  %v2697_v3 = vld [vmem:[%s3448_s1 + $0x70] sm:$0xff]   ;;  %vm2792_vm0 = vmmov 0   ;;  %v2699_v5 = vld [vmem:[%s3448_s1 + $0x68] sm:$0xff]   ;;  %s3457_s15 = smov (!%p252_p4, %s2781_s15), 1 }
   0xd   : > { %2326 = vmatprep.subr.bf16.mxu0 %v2791_v1  ;;  %2362 = vmatprep.subr.bf16.mxu1 %v2791_v1  ;;  %v2696_v2 = vld [vmem:[%s3448_s1 + $0x38] sm:$0xff]   ;;  %v2698_v4 = vld [vmem:[%s3448_s1 + $0x30] sm:$0xff]   ;;  %v2700_v6 = vld [vmem:[%s3448_s1 + $0x28] sm:$0xff]   ;;  %s2666_s13 = smul.u32 104, %s3457_s15 }
   0xe   : > { %2327 = vmatpush3.bf16.msra.mxu0 %v2695_v0  ;;  %2342 = vmatprep.mubr.msk.bf16.mxu0 %vm2792_vm0, %v2791_v1  ;;  %v2701_v7 = vld [vmem:[%s3448_s1 + $0x60] sm:$0xff]   ;;  %v2703_v9 = vld [vmem:[%s3448_s1 + $0x58] sm:$0xff]   ;;  %v2705_v11 = vld [vmem:[%s3448_s1 + $0x50] sm:$0xff]   ;;  %s2668_s23 = smul.u32 40, %s3457_s15 }
   0xf   : > { %2363 = vmatpush3.bf16.msra.mxu1 %v2696_v2  ;;  %2328 = vmatprep.subr.bf16.mxu0 %v2791_v1  ;;  %v2702_v8 = vld [vmem:[%s3448_s1 + $0x20] sm:$0xff]   ;;  %v2704_v10 = vld [vmem:[%s3448_s1 + $0x18] sm:$0xff]   ;;  %v2706_v12 = vld [vmem:[%s3448_s1 + $0x10] sm:$0xff]   ;;  %s2898_s24 = scalar_lea.vmem %s3447_s0, %s2666_s13 }
  0x10   : > { %2364 = vmatprep.subr.bf16.mxu1 %v2791_v1  ;;  %2378 = vmatprep.mubr.msk.bf16.mxu1 %vm2792_vm0, %v2791_v1  ;;  %v2707_v13 = vld [vmem:[%s3448_s1 + $0x48] sm:$0xff]   ;;  %v2709_v15 = vld [vmem:[%s3448_s1 + $0x40] sm:$0xff]   ;;  %v2711_v23 = vld [vmem:[%s3448_s1 + $0xb8] sm:$0xff]   ;;  %s3416_s26 = scalar_lea.vmem %s3451_s4, %s2668_s23 }
  0x11   : > { %v2708_v14 = vld [vmem:[%s3448_s1 + $0x8] sm:$0xff]   ;;  %v2710_v17 = vld [vmem:[%s3448_s1] sm:$0xff]   ;;  %v2713_v24 = vld [vmem:[%s3448_s1 + $0xf8] sm:$0xff]  }
  0x12   : > { %2329 = vmatpush3.bf16.msra.mxu0 %v2697_v3  ;;  %v312_v16 = vld [vmem:[%s2898_s24 + $0x1] sm:$0xff]  ;;  %v313_v18 = vld [vmem:[%s2898_s24 + $0x9] sm:$0xff]  ;;  %v314_v26 = vld [vmem:[%s2898_s24 + $0x11] sm:$0xff] }
  0x13   : > { %2365 = vmatpush3.bf16.msra.mxu1 %v2698_v4  ;;  %2330 = vmatprep.subr.bf16.mxu0 %v2791_v1  ;;  %v281_v19 = vld [vmem:[%s2898_s24] sm:$0xff]  ;;  %v282_v20 = vld [vmem:[%s2898_s24 + $0x8] sm:$0xff]  ;;  %v322_v21 = vpack.c.bf16 %v313_v18, %v312_v16  ;;  %v2712_v25 = vld [vmem:[%s3448_s1 + $0xb0] sm:$0xff]  }
  0x14   : > { %2366 = vmatprep.subr.bf16.mxu1 %v2791_v1  ;;  %v291_v22 = vpack.c.bf16 %v282_v20, %v281_v19  ;;  %v315_v27 = vld [vmem:[%s2898_s24 + $0x19] sm:$0xff]  ;;  %v283_v28 = vld [vmem:[%s2898_s24 + $0x10] sm:$0xff]  ;;  %v2714_v33 = vld [vmem:[%s3448_s1 + $0xa8] sm:$0xff]  }
  0x15   : > { %v284_v29 = vld [vmem:[%s2898_s24 + $0x18] sm:$0xff]  ;;  %v2715_v30 = vld [vmem:[%s3448_s1 + $0xf0] sm:$0xff]   ;;  %v323_v31 = vpack.c.bf16 %v315_v27, %v314_v26  ;;  %v316_v34 = vld [vmem:[%s2898_s24 + $0x21] sm:$0xff] }
  0x16   : > { %2331 = vmatpush3.bf16.msra.mxu0 %v2699_v5  ;;  %v292_v32 = vpack.c.bf16 %v284_v29, %v283_v28  ;;  %v2717_v35 = vld [vmem:[%s3448_s1 + $0xe8] sm:$0xff]   ;;  %v285_v37 = vld [vmem:[%s2898_s24 + $0x20] sm:$0xff]  ;;  %v2718_v43 = vld [vmem:[%s3448_s1 + $0x98] sm:$0xff]  }
  0x17   : > { %2367 = vmatpush3.bf16.msra.mxu1 %v2700_v6  ;;  %2332 = vmatprep.subr.bf16.mxu0 %v2791_v1  ;;  %v317_v36 = vld [vmem:[%s2898_s24 + $0x29] sm:$0xff]  ;;  %v2716_v38 = vld [vmem:[%s3448_s1 + $0xa0] sm:$0xff]   ;;  %v318_v44 = vld [vmem:[%s2898_s24 + $0x31] sm:$0xff] }
  0x18   : > { %2368 = vmatprep.subr.bf16.mxu1 %v2791_v1  ;;  %v286_v39 = vld [vmem:[%s2898_s24 + $0x28] sm:$0xff]  ;;  %v2719_v40 = vld [vmem:[%s3448_s1 + $0xe0] sm:$0xff]   ;;  %v324_v41 = vpack.c.bf16 %v317_v36, %v316_v34  ;;  %v2720_v45 = vld [vmem:[%s3448_s1 + $0xd8] sm:$0xff]  }
  0x19   : > { %v293_v42 = vpack.c.bf16 %v286_v39, %v285_v37  ;;  %v319_v46 = vld [vmem:[%s2898_s24 + $0x39] sm:$0xff]  ;;  %v287_v47 = vld [vmem:[%s2898_s24 + $0x30] sm:$0xff]  ;;  %v2723_v53 = vld [vmem:[%s3448_s1 + $0x88] sm:$0xff]  }
  0x1a   : > { %2333 = vmatpush3.bf16.msra.mxu0 %v2701_v7  ;;  %v2721_v48 = vld [vmem:[%s3448_s1 + $0x90] sm:$0xff]   ;;  %v288_v49 = vld [vmem:[%s2898_s24 + $0x38] sm:$0xff]  ;;  %v325_v51 = vpack.c.bf16 %v319_v46, %v318_v44  ;;  %v2724_v54 = vld [vmem:[%s3448_s1 + $0xc8] sm:$0xff]  }
  0x1b   : > { %2369 = vmatpush3.bf16.msra.mxu1 %v2702_v8  ;;  %2334 = vmatprep.subr.bf16.mxu0 %v2791_v1  ;;  %v2722_v50 = vld [vmem:[%s3448_s1 + $0xd0] sm:$0xff]   ;;  %v294_v52 = vpack.c.bf16 %v288_v49, %v287_v47  ;;  %v320_v55 = vld [vmem:[%s2898_s24 + $0x41] sm:$0xff]  ;;  %v2727_v5 = vld [vmem:[%s3448_s1 + $0x138] sm:$0xff]  }
  0x1c   : > { %2370 = vmatprep.subr.bf16.mxu1 %v2791_v1  ;;  %v321_v56 = vld [vmem:[%s2898_s24 + $0x49] sm:$0xff]  ;;  %v289_v57 = vld [vmem:[%s2898_s24 + $0x40] sm:$0xff]  ;;  %v750_v2 = vld [vmem:[%s2898_s24 + $0x12] sm:$0xff] }
  0x1d   : > { %v290_v58 = vld [vmem:[%s2898_s24 + $0x48] sm:$0xff]  ;;  %v2725_v59 = vld [vmem:[%s3448_s1 + $0x80] sm:$0xff]   ;;  %v326_v61 = vpack.c.bf16 %v321_v56, %v320_v55  ;;  %v2729_v6 = vld [vmem:[%s3448_s1 + $0x178] sm:$0xff]  }
  0x1e   : > { %2335 = vmatpush3.bf16.msra.mxu0 %v2703_v9  ;;  %v2726_v60 = vld [vmem:[%s3448_s1 + $0xc0] sm:$0xff]   ;;  %v295_v62 = vpack.c.bf16 %v290_v58, %v289_v57  ;;  %v587_v0 = vld [vmem:[%s2898_s24 + $0xa] sm:$0xff]  ;;  %v2745_v44 = vld [vmem:[%s3448_s1 + $0x1f8] sm:$0xff]  }
  0x1f   : > { %2371 = vmatpush3.bf16.msra.mxu1 %v2704_v10  ;;  %2336 = vmatprep.subr.bf16.mxu0 %v2791_v1  ;;  %v586_v63 = vld [vmem:[%s2898_s24 + $0x2] sm:$0xff]  ;;  %v759_v4 = vpack.c.bf16 %v750_v2, %v587_v0  ;;  %v2728_v7 = vld [vmem:[%s3448_s1 + $0x130] sm:$0xff]   ;;  %v589_v8 = vld [vmem:[%s2898_s24 + $0x1a] sm:$0xff] }
  0x20   : > { %2372 = vmatprep.subr.bf16.mxu1 %v2791_v1  ;;  %v596_v3 = vpack.c.bf16 %v587_v0, %v586_v63  ;;  %v752_v9 = vld [vmem:[%s2898_s24 + $0x22] sm:$0xff]  ;;  %v2731_v10 = vld [vmem:[%s3448_s1 + $0x170] sm:$0xff]   ;;  %v2750_v63 = vld [vmem:[%s3448_s1 + $0x198] sm:$0xff]  }
  0x21   : > { %v2732_v16 = vld [vmem:[%s3448_s1 + $0x120] sm:$0xff]   ;;  %v2738_v26 = vld [vmem:[%s3448_s1 + $0x150] sm:$0xff]   ;;  %v2739_v29 = vld [vmem:[%s3448_s1 + $0x108] sm:$0xff]  }
  0x22   : > { %2337 = vmatpush3.bf16.msra.mxu0 %v2705_v11  ;;  %v597_v11 = vpack.c.bf16 %v589_v8, %v750_v2  ;;  %v2735_v18 = vld [vmem:[%s3448_s1 + $0x160] sm:$0xff]   ;;  %v912_v37 = vld [vmem:[%s2898_s24 + $0xb] sm:$0xff]  ;;  %v917_v56 = vld [vmem:[%s2898_s24 + $0x33] sm:$0xff] }
  0x23   : > { %2373 = vmatpush3.bf16.msra.mxu1 %v2706_v12  ;;  %2338 = vmatprep.subr.bf16.mxu0 %v2791_v1  ;;  %v760_v12 = vpack.c.bf16 %v752_v9, %v589_v8  ;;  %v2742_v34 = vld [vmem:[%s3448_s1 + $0x140] sm:$0xff]   ;;  %v1075_v39 = vld [vmem:[%s2898_s24 + $0xc] sm:$0xff]  ;;  %v2752_v0 = vld [vmem:[%s3448_s1 + $0x1d8] sm:$0xff]  }
  0x24   : > { %2374 = vmatprep.subr.bf16.mxu1 %v2791_v1  ;;  %v914_v46 = vld [vmem:[%s2898_s24 + $0x1b] sm:$0xff]  ;;  %v915_v47 = vld [vmem:[%s2898_s24 + $0x23] sm:$0xff]  ;;  %v916_v55 = vld [vmem:[%s2898_s24 + $0x2b] sm:$0xff] }
  0x25   : > { %v3142_v49 = vld [vmem:[%s2898_s24 + $0x24] sm:$0xff]  ;;  %v3170_v58 = vld [vmem:[%s2898_s24 + $0x2c] sm:$0xff]  ;;  %v918_v2 = vld [vmem:[%s2898_s24 + $0x3b] sm:$0xff] }
  0x26   : > { %2339 = vmatpush3.bf16.msra.mxu0 %v2707_v13  ;;  %v2730_v13 = vld [vmem:[%s3448_s1 + $0x128] sm:$0xff]   ;;  %v2748_v57 = vld [vmem:[%s3448_s1 + $0x1a0] sm:$0xff]  }
  0x27   : > { %2375 = vmatpush3.bf16.msra.mxu1 %v2708_v14  ;;  %2340 = vmatprep.subr.bf16.mxu0 %v2791_v1  ;;  %v2733_v14 = vld [vmem:[%s3448_s1 + $0x168] sm:$0xff]  }
  0x28   : > { %2376 = vmatprep.subr.bf16.mxu1 %v2791_v1 }
  0x2a   : > { %2341 = vmatpush3.bf16.msra.mxu0 %v2709_v15  ;;  %v591_v15 = vld [vmem:[%s2898_s24 + $0x2a] sm:$0xff] }
  0x2b   : > { %2377 = vmatpush3.bf16.msra.mxu1 %v2710_v17  ;;  %2398 = vmatprep.subr.bf16.mxu0 %v2791_v1  ;;  %v754_v17 = vld [vmem:[%s2898_s24 + $0x32] sm:$0xff]  ;;  %v598_v19 = vpack.c.bf16 %v591_v15, %v752_v9 }
  0x2c   : > { %2434 = vmatprep.subr.bf16.mxu1 %v2791_v1  ;;  %v761_v20 = vpack.c.bf16 %v754_v17, %v591_v15  ;;  %v3230_v15 = vld [vmem:[%s2898_s24 + $0x54] sm:$0xff] }
  0x2d   : > { %2343 = vmatmul.mubr.bf16.vlgmr.msra.gmra.mxu0 %v322_v21  ;;  %v2734_v21 = vld [vmem:[%s3448_s1 + $0x118] sm:$0xff]  }
  0x2e   : > { %2379 = vmatmul.mubr.bf16.vlgmr.msra.gmra.mxu1 %v291_v22  ;;  %2399 = vmatpush3.bf16.msra.mxu0 %v2711_v23  ;;  %v2736_v22 = vld [vmem:[%s3448_s1 + $0x158] sm:$0xff]  }
  0x2f   : > { %2400 = vmatprep.subr.bf16.mxu0 %v2791_v1  ;;  %2346 = vmatprep.mubr.msk.bf16.mxu0 %vm2792_vm0, %v2791_v1  ;;  %v593_v23 = vld [vmem:[%s2898_s24 + $0x3a] sm:$0xff] }
  0x30   : > { %2382 = vmatprep.mubr.msk.bf16.mxu1 %vm2792_vm0, %v2791_v1  ;;  %2435 = vmatpush3.bf16.msra.mxu1 %v2713_v24  ;;  %v2737_v24 = vld [vmem:[%s3448_s1 + $0x110] sm:$0xff]   ;;  %v599_v27 = vpack.c.bf16 %v593_v23, %v754_v17  ;;  %v2758_v17 = vld [vmem:[%s3448_s1 + $0x1c0] sm:$0xff]  }
  0x31   : > { %2436 = vmatprep.subr.bf16.mxu1 %v2791_v1 }
  0x32   : > { %2401 = vmatpush3.bf16.msra.mxu0 %v2712_v25  ;;  %v756_v25 = vld [vmem:[%s2898_s24 + $0x42] sm:$0xff] }
  0x33   : > { %2402 = vmatprep.subr.bf16.mxu0 %v2791_v1  ;;  %v762_v28 = vpack.c.bf16 %v756_v25, %v593_v23 }
  0x34   : > { %2437 = vmatpush3.bf16.msra.mxu1 %v2715_v30  ;;  %v2740_v30 = vld [vmem:[%s3448_s1 + $0x148] sm:$0xff]  }
  0x35   : > { %2347 = vmatmul.mubr.bf16.gmra.mxu0 %v323_v31  ;;  %2438 = vmatprep.subr.bf16.mxu1 %v2791_v1  ;;  %v595_v31 = vld [vmem:[%s2898_s24 + $0x4a] sm:$0xff] }
  0x36   : > { %2383 = vmatmul.mubr.bf16.gmra.mxu1 %v292_v32  ;;  %2403 = vmatpush3.bf16.msra.mxu0 %v2714_v33  ;;  %v758_v32 = vld [vmem:[%s2898_s24 + $0x52] sm:$0xff]  ;;  %v2741_v33 = vld [vmem:[%s3448_s1 + $0x100] sm:$0xff]  }
  0x37   : > { %2350 = vmatprep.mubr.msk.bf16.mxu0 %vm2792_vm0, %v2791_v1  ;;  %2386 = vmatprep.mubr.msk.bf16.mxu1 %vm2792_vm0, %v2791_v1  ;;  %v763_v36 = vpack.c.bf16 %v758_v32, %v595_v31  ;;  %v1405_v32 = vld [vmem:[%s2898_s24 + $0x35] sm:$0xff] }
  0x38   : > { %2404 = vmatprep.subr.bf16.mxu0 %v2791_v1  ;;  %2439 = vmatpush3.bf16.msra.mxu1 %v2717_v35  ;;  %v600_v35 = vpack.c.bf16 %v595_v31, %v756_v25  ;;  %v2760_v25 = vld [vmem:[%s3448_s1 + $0x230] sm:$0xff]   ;;  %v2762_v31 = vld [vmem:[%s3448_s1 + $0x220] sm:$0xff]  }
  0x39   : > { %2440 = vmatprep.subr.bf16.mxu1 %v2791_v1 }
  0x3a   : > { %2405 = vmatpush3.bf16.msra.mxu0 %v2716_v38  ;;  %v913_v38 = vld [vmem:[%s2898_s24 + $0x13] sm:$0xff] }
  0x3b   : > { %2406 = vmatprep.subr.bf16.mxu0 %v2791_v1 }
  0x3c   : > { %2441 = vmatpush3.bf16.msra.mxu1 %v2719_v40  ;;  %v3121_v40 = vld [vmem:[%s2898_s24 + $0x14] sm:$0xff] }
  0x3d   : > { %2351 = vmatmul.mubr.bf16.gmra.mxu0 %v324_v41  ;;  %2442 = vmatprep.subr.bf16.mxu1 %v2791_v1  ;;  %v922_v41 = vpack.c.bf16 %v913_v38, %v912_v37  ;;  %v2764_v37 = vld [vmem:[%s3448_s1 + $0x210] sm:$0xff]   ;;  %v1407_v38 = vld [vmem:[%s2898_s24 + $0x45] sm:$0xff] }
  0x3e   : > { %2387 = vmatmul.mubr.bf16.gmra.mxu1 %v293_v42  ;;  %2407 = vmatpush3.bf16.msra.mxu0 %v2718_v43  ;;  %v1085_v42 = vpack.c.bf16 %v3121_v40, %v1075_v39  ;;  %v2743_v43 = vld [vmem:[%s3448_s1 + $0x1b8] sm:$0xff]   ;;  %v1408_v39 = vld [vmem:[%s2898_s24 + $0x4d] sm:$0xff] }
  0x3f   : > { %2354 = vmatprep.mubr.msk.bf16.mxu0 %vm2792_vm0, %v2791_v1  ;;  %2390 = vmatprep.mubr.msk.bf16.mxu1 %vm2792_vm0, %v2791_v1 }
  0x40   : > { %2408 = vmatprep.subr.bf16.mxu0 %v2791_v1  ;;  %2443 = vmatpush3.bf16.msra.mxu1 %v2720_v45  ;;  %v2744_v45 = vld [vmem:[%s3448_s1 + $0x1b0] sm:$0xff]  }
  0x41   : > { %2444 = vmatprep.subr.bf16.mxu1 %v2791_v1 }
  0x42   : > { %2409 = vmatpush3.bf16.msra.mxu0 %v2721_v48  ;;  %v3139_v48 = vld [vmem:[%s2898_s24 + $0x1c] sm:$0xff] }
  0x43   : > { %2410 = vmatprep.subr.bf16.mxu0 %v2791_v1 }
  0x44   : > { %2445 = vmatpush3.bf16.msra.mxu1 %v2722_v50  ;;  %v2747_v50 = vld [vmem:[%s3448_s1 + $0x1f0] sm:$0xff]  }
  0x45   : > { %2355 = vmatmul.mubr.bf16.gmra.mxu0 %v325_v51  ;;  %2446 = vmatprep.subr.bf16.mxu1 %v2791_v1  ;;  %v923_v51 = vpack.c.bf16 %v915_v47, %v914_v46  ;;  %v2766_v46 = vld [vmem:[%s3448_s1 + $0x200] sm:$0xff]  }
  0x46   : > { %2391 = vmatmul.mubr.bf16.gmra.mxu1 %v294_v52  ;;  %2358 = vmatprep.mubr.msk.bf16.mxu0 %vm2792_vm0, %v2791_v1  ;;  %v1086_v52 = vpack.c.bf16 %v3142_v49, %v3139_v48 }
  0x47   : > { %2394 = vmatprep.mubr.msk.bf16.mxu1 %vm2792_vm0, %v2791_v1  ;;  %2411 = vmatpush3.bf16.msra.mxu0 %v2723_v53  ;;  %v2746_v53 = vld [vmem:[%s3448_s1 + $0x1a8] sm:$0xff]  }
  0x48   : > { %2447 = vmatpush3.bf16.msra.mxu1 %v2724_v54  ;;  %2412 = vmatprep.subr.bf16.mxu0 %v2791_v1  ;;  %v2749_v54 = vld [vmem:[%s3448_s1 + $0x1e8] sm:$0xff]  }
  0x49   : > { %2448 = vmatprep.subr.bf16.mxu1 %v2791_v1 }
  0x4b   : > { %2413 = vmatpush3.bf16.msra.mxu0 %v2725_v59  ;;  %v3173_v59 = vld [vmem:[%s2898_s24 + $0x34] sm:$0xff] }
  0x4c   : > { %2449 = vmatpush3.bf16.msra.mxu1 %v2726_v60  ;;  %2470 = vmatprep.subr.bf16.mxu0 %v2791_v1  ;;  %v2751_v60 = vld [vmem:[%s3448_s1 + $0x1e0] sm:$0xff]  }
  0x4d   : > { %2359 = vmatmul.mubr.bf16.gmra.mxu0 %v326_v61  ;;  %2506 = vmatprep.subr.bf16.mxu1 %v2791_v1  ;;  %v924_v61 = vpack.c.bf16 %v917_v56, %v916_v55  ;;  %v1566_v55 = vld [vmem:[%s2898_s24 + $0x26] sm:$0xff]  ;;  %v1567_v56 = vld [vmem:[%s2898_s24 + $0x2e] sm:$0xff] }
  0x4e   : > { %2395 = vmatmul.mubr.bf16.gmra.mxu1 %v295_v62  ;;  %2414 = vmatprep.mubr.msk.bf16.mxu0 %vm2792_vm0, %v2791_v1  ;;  %v1087_v62 = vpack.c.bf16 %v3173_v59, %v3170_v58 }
  0x4f   : > { %2450 = vmatprep.mubr.msk.bf16.mxu1 %vm2792_vm0, %v2791_v1 }
  0x55   : > { %2415 = vmatmul.mubr.bf16.vlgmr.msra.gmra.mxu0 %v596_v3  ;;  %v919_v3 = vld [vmem:[%s2898_s24 + $0x43] sm:$0xff] }
  0x56   : > { %2451 = vmatmul.mubr.bf16.vlgmr.msra.gmra.mxu1 %v759_v4  ;;  %2471 = vmatpush3.bf16.msra.mxu0 %v2727_v5  ;;  %v2753_v4 = vld [vmem:[%s3448_s1 + $0x190] sm:$0xff]   ;;  %v3200_v5 = vld [vmem:[%s2898_s24 + $0x3c] sm:$0xff]  ;;  %v925_v8 = vpack.c.bf16 %v919_v3, %v918_v2 }
  0x57   : > { %2472 = vmatprep.subr.bf16.mxu0 %v2791_v1  ;;  %2418 = vmatprep.mubr.msk.bf16.mxu0 %vm2792_vm0, %v2791_v1 }
  0x58   : > { %2454 = vmatprep.mubr.msk.bf16.mxu1 %vm2792_vm0, %v2791_v1  ;;  %2507 = vmatpush3.bf16.msra.mxu1 %v2729_v6  ;;  %v3203_v6 = vld [vmem:[%s2898_s24 + $0x44] sm:$0xff] }
  0x59   : > { %2508 = vmatprep.subr.bf16.mxu1 %v2791_v1  ;;  %v1088_v9 = vpack.c.bf16 %v3203_v6, %v3200_v5 }
  0x5a   : > { %2473 = vmatpush3.bf16.msra.mxu0 %v2728_v7  ;;  %v2754_v7 = vld [vmem:[%s3448_s1 + $0x1d0] sm:$0xff]  }
  0x5b   : > { %2474 = vmatprep.subr.bf16.mxu0 %v2791_v1 }
  0x5c   : > { %2509 = vmatpush3.bf16.msra.mxu1 %v2731_v10  ;;  %v2755_v10 = vld [vmem:[%s3448_s1 + $0x188] sm:$0xff]  }
  0x5d   : > { %2419 = vmatmul.mubr.bf16.gmra.mxu0 %v597_v11  ;;  %2510 = vmatprep.subr.bf16.mxu1 %v2791_v1  ;;  %v2756_v11 = vld [vmem:[%s3448_s1 + $0x1c8] sm:$0xff]  }
  0x5e   : > { %2455 = vmatmul.mubr.bf16.gmra.mxu1 %v760_v12  ;;  %2475 = vmatpush3.bf16.msra.mxu0 %v2730_v13  ;;  %v920_v12 = vld [vmem:[%s2898_s24 + $0x4b] sm:$0xff]  ;;  %v921_v13 = vld [vmem:[%s2898_s24 + $0x53] sm:$0xff] }
  0x5f   : > { %2422 = vmatprep.mubr.msk.bf16.mxu0 %vm2792_vm0, %v2791_v1  ;;  %2458 = vmatprep.mubr.msk.bf16.mxu1 %vm2792_vm0, %v2791_v1 }
  0x60   : > { %2476 = vmatprep.subr.bf16.mxu0 %v2791_v1  ;;  %2511 = vmatpush3.bf16.msra.mxu1 %v2733_v14  ;;  %v3227_v14 = vld [vmem:[%s2898_s24 + $0x4c] sm:$0xff] }
  0x61   : > { %2512 = vmatprep.subr.bf16.mxu1 %v2791_v1 }
  0x62   : > { %2477 = vmatpush3.bf16.msra.mxu0 %v2732_v16  ;;  %v2757_v16 = vld [vmem:[%s3448_s1 + $0x180] sm:$0xff]  }
  0x63   : > { %2478 = vmatprep.subr.bf16.mxu0 %v2791_v1 }
  0x64   : > { %2513 = vmatpush3.bf16.msra.mxu1 %v2735_v18  ;;  %v926_v18 = vpack.c.bf16 %v921_v13, %v920_v12 }
  0x65   : > { %2423 = vmatmul.mubr.bf16.gmra.mxu0 %v598_v19  ;;  %2514 = vmatprep.subr.bf16.mxu1 %v2791_v1  ;;  %v1089_v19 = vpack.c.bf16 %v3230_v15, %v3227_v14 }
  0x66   : > { %2459 = vmatmul.mubr.bf16.gmra.mxu1 %v761_v20  ;;  %2479 = vmatpush3.bf16.msra.mxu0 %v2734_v21  ;;  %v1401_v20 = vld [vmem:[%s2898_s24 + $0x15] sm:$0xff]  ;;  %v1402_v21 = vld [vmem:[%s2898_s24 + $0x1d] sm:$0xff] }
  0x67   : > { %2426 = vmatprep.mubr.msk.bf16.mxu0 %vm2792_vm0, %v2791_v1  ;;  %2462 = vmatprep.mubr.msk.bf16.mxu1 %vm2792_vm0, %v2791_v1  ;;  %v1411_v23 = vpack.c.bf16 %v1402_v21, %v1401_v20 }
  0x68   : > { %2480 = vmatprep.subr.bf16.mxu0 %v2791_v1  ;;  %2515 = vmatpush3.bf16.msra.mxu1 %v2736_v22  ;;  %v1248_v22 = vpack.c.bf16 %v3139_v48, %v3121_v40  ;;  %v1251_v40 = vpack.c.bf16 %v3227_v14, %v3203_v6 }
  0x69   : > { %2516 = vmatprep.subr.bf16.mxu1 %v2791_v1 }
  0x6a   : > { %2481 = vmatpush3.bf16.msra.mxu0 %v2737_v24  ;;  %v2759_v24 = vld [vmem:[%s3448_s1 + $0x238] sm:$0xff]  }
  0x6b   : > { %2482 = vmatprep.subr.bf16.mxu0 %v2791_v1 }
  0x6c   : > { %2517 = vmatpush3.bf16.msra.mxu1 %v2738_v26  ;;  %v1403_v26 = vld [vmem:[%s2898_s24 + $0x25] sm:$0xff] }
  0x6d   : > { %2427 = vmatmul.mubr.bf16.gmra.mxu0 %v599_v27  ;;  %2518 = vmatprep.subr.bf16.mxu1 %v2791_v1  ;;  %v1404_v27 = vld [vmem:[%s2898_s24 + $0x2d] sm:$0xff] }
  0x6e   : > { %2463 = vmatmul.mubr.bf16.gmra.mxu1 %v762_v28  ;;  %2430 = vmatprep.mubr.msk.bf16.mxu0 %vm2792_vm0, %v2791_v1  ;;  %v1249_v28 = vpack.c.bf16 %v3170_v58, %v3142_v49  ;;  %v1564_v49 = vld [vmem:[%s2898_s24 + $0x16] sm:$0xff]  ;;  %v1573_v58 = vld [vmem:[%s2898_s24 + $0x5e] sm:$0xff] }
  0x6f   : > { %2466 = vmatprep.mubr.msk.bf16.mxu1 %vm2792_vm0, %v2791_v1  ;;  %2483 = vmatpush3.bf16.msra.mxu0 %v2739_v29  ;;  %v1412_v29 = vpack.c.bf16 %v1404_v27, %v1403_v26 }
  0x70   : > { %2519 = vmatpush3.bf16.msra.mxu1 %v2740_v30  ;;  %2484 = vmatprep.subr.bf16.mxu0 %v2791_v1  ;;  %v2761_v30 = vld [vmem:[%s3448_s1 + $0x228] sm:$0xff]  }
  0x71   : > { %2520 = vmatprep.subr.bf16.mxu1 %v2791_v1 }
  0x73   : > { %2485 = vmatpush3.bf16.msra.mxu0 %v2741_v33  ;;  %v1406_v33 = vld [vmem:[%s2898_s24 + $0x3d] sm:$0xff] }
  0x74   : > { %2521 = vmatpush3.bf16.msra.mxu1 %v2742_v34  ;;  %2542 = vmatprep.subr.bf16.mxu0 %v2791_v1  ;;  %v1250_v34 = vpack.c.bf16 %v3200_v5, %v3173_v59  ;;  %v1575_v59 = vpack.c.bf16 %v1567_v56, %v1566_v55 }
  0x75   : > { %2431 = vmatmul.mubr.bf16.gmra.mxu0 %v600_v35  ;;  %2578 = vmatprep.subr.bf16.mxu1 %v2791_v1  ;;  %v1413_v35 = vpack.c.bf16 %v1406_v33, %v1405_v32 }
  0x76   : > { %2467 = vmatmul.mubr.bf16.gmra.mxu1 %v763_v36  ;;  %2486 = vmatprep.mubr.msk.bf16.mxu0 %vm2792_vm0, %v2791_v1  ;;  %v2763_v36 = vld [vmem:[%s3448_s1 + $0x218] sm:$0xff]  }
  0x77   : > { %2522 = vmatprep.mubr.msk.bf16.mxu1 %vm2792_vm0, %v2791_v1 }
  0x7d   : > { %2487 = vmatmul.mubr.bf16.vlgmr.msra.gmra.mxu0 %v922_v41  ;;  %v1414_v41 = vpack.c.bf16 %v1408_v39, %v1407_v38 }
  0x7e   : > { %2523 = vmatmul.mubr.bf16.vlgmr.msra.gmra.mxu1 %v1085_v42  ;;  %2543 = vmatpush3.bf16.msra.mxu0 %v2743_v43  ;;  %v2765_v42 = vld [vmem:[%s3448_s1 + $0x208] sm:$0xff]   ;;  %v1247_v43 = vld [vmem:[%s2898_s24 + $0x5c] sm:$0xff] }
  0x7f   : > { %2544 = vmatprep.subr.bf16.mxu0 %v2791_v1  ;;  %2490 = vmatprep.mubr.msk.bf16.mxu0 %vm2792_vm0, %v2791_v1  ;;  %v1252_v47 = vpack.c.bf16 %v1247_v43, %v3230_v15 }
  0x80   : > { %2526 = vmatprep.mubr.msk.bf16.mxu1 %vm2792_vm0, %v2791_v1  ;;  %2579 = vmatpush3.bf16.msra.mxu1 %v2745_v44  ;;  %v1409_v44 = vld [vmem:[%s2898_s24 + $0x55] sm:$0xff] }
  0x81   : > { %2580 = vmatprep.subr.bf16.mxu1 %v2791_v1 }
  0x82   : > { %2545 = vmatpush3.bf16.msra.mxu0 %v2744_v45  ;;  %v1410_v45 = vld [vmem:[%s2898_s24 + $0x5d] sm:$0xff] }
  0x83   : > { %2546 = vmatprep.subr.bf16.mxu0 %v2791_v1  ;;  %v1415_v48 = vpack.c.bf16 %v1410_v45, %v1409_v44 }
  0x84   : > { %2581 = vmatpush3.bf16.msra.mxu1 %v2747_v50  ;;  %v1565_v50 = vld [vmem:[%s2898_s24 + $0x1e] sm:$0xff] }
  0x85   : > { %2491 = vmatmul.mubr.bf16.gmra.mxu0 %v923_v51  ;;  %2582 = vmatprep.subr.bf16.mxu1 %v2791_v1  ;;  %v1570_v51 = vld [vmem:[%s2898_s24 + $0x46] sm:$0xff] }
  0x86   : > { %2527 = vmatmul.mubr.bf16.gmra.mxu1 %v1086_v52  ;;  %2547 = vmatpush3.bf16.msra.mxu0 %v2746_v53  ;;  %v1571_v52 = vld [vmem:[%s2898_s24 + $0x4e] sm:$0xff]  ;;  %v1574_v53 = vpack.c.bf16 %v1565_v50, %v1564_v49 }
  0x87   : > { %2494 = vmatprep.mubr.msk.bf16.mxu0 %vm2792_vm0, %v2791_v1  ;;  %2530 = vmatprep.mubr.msk.bf16.mxu1 %vm2792_vm0, %v2791_v1 }
  0x88   : > { %2548 = vmatprep.subr.bf16.mxu0 %v2791_v1  ;;  %2583 = vmatpush3.bf16.msra.mxu1 %v2749_v54  ;;  %v1577_v54 = vpack.c.bf16 %v1571_v52, %v1570_v51 }
  0x89   : > { %2584 = vmatprep.subr.bf16.mxu1 %v2791_v1 }
  0x8a   : > { %2549 = vmatpush3.bf16.msra.mxu0 %v2748_v57  ;;  %v1572_v57 = vld [vmem:[%s2898_s24 + $0x56] sm:$0xff] }
  0x8b   : > { %2550 = vmatprep.subr.bf16.mxu0 %v2791_v1 }
  0x8c   : > { %2585 = vmatpush3.bf16.msra.mxu1 %v2751_v60  ;;  %v1578_v60 = vpack.c.bf16 %v1573_v58, %v1572_v57 }
  0x8d   : > { %2495 = vmatmul.mubr.bf16.gmra.mxu0 %v924_v61  ;;  %2586 = vmatprep.subr.bf16.mxu1 %v2791_v1  ;;  %v1568_v61 = vld [vmem:[%s2898_s24 + $0x36] sm:$0xff] }
  0x8e   : > { %2531 = vmatmul.mubr.bf16.gmra.mxu1 %v1087_v62  ;;  %2551 = vmatpush3.bf16.msra.mxu0 %v2750_v63  ;;  %v1569_v62 = vld [vmem:[%s2898_s24 + $0x3e] sm:$0xff]  ;;  %s2667_s24 = smul.u32 80, %s3457_s15 }
  0x8f   : > { %2498 = vmatprep.mubr.msk.bf16.mxu0 %vm2792_vm0, %v2791_v1  ;;  %2534 = vmatprep.mubr.msk.bf16.mxu1 %vm2792_vm0, %v2791_v1  ;;  %v1576_v63 = vpack.c.bf16 %v1569_v62, %v1568_v61 }
  0x90   : > { %2552 = vmatprep.subr.bf16.mxu0 %v2791_v1  ;;  %2587 = vmatpush3.bf16.msra.mxu1 %v2752_v0  ;;  %s3392_s22 = scalar_lea.vmem %s3450_s3, %s2667_s24 }
  0x91   : > { %2588 = vmatprep.subr.bf16.mxu1 %v2791_v1 }
  0x92   : > { %2553 = vmatpush3.bf16.msra.mxu0 %v2753_v4 }
  0x93   : > { %2554 = vmatprep.subr.bf16.mxu0 %v2791_v1 }
  0x94   : > { %2589 = vmatpush3.bf16.msra.mxu1 %v2754_v7 }
  0x95   : > { %2499 = vmatmul.mubr.bf16.gmra.mxu0 %v925_v8  ;;  %2590 = vmatprep.subr.bf16.mxu1 %v2791_v1 }
  0x96   : > { %2535 = vmatmul.mubr.bf16.gmra.mxu1 %v1088_v9  ;;  %2502 = vmatprep.mubr.msk.bf16.mxu0 %vm2792_vm0, %v2791_v1 }
  0x97   : > { %2538 = vmatprep.mubr.msk.bf16.mxu1 %vm2792_vm0, %v2791_v1  ;;  %2555 = vmatpush3.bf16.msra.mxu0 %v2755_v10 }
  0x98   : > { %2591 = vmatpush3.bf16.msra.mxu1 %v2756_v11  ;;  %2556 = vmatprep.subr.bf16.mxu0 %v2791_v1 }
  0x99   : > { %2592 = vmatprep.subr.bf16.mxu1 %v2791_v1 }
  0x9b   : > { %2557 = vmatpush3.bf16.msra.mxu0 %v2757_v16 }
  0x9c   : > { %2593 = vmatpush3.bf16.msra.mxu1 %v2758_v17  ;;  %2614 = vmatprep.subr.bf16.mxu0 %v2791_v1 }
  0x9d   : > { %2503 = vmatmul.mubr.bf16.gmra.mxu0 %v926_v18  ;;  %2650 = vmatprep.subr.bf16.mxu1 %v2791_v1 }
  0x9e   : > { %2539 = vmatmul.mubr.bf16.gmra.mxu1 %v1089_v19  ;;  %2558 = vmatprep.mubr.msk.bf16.mxu0 %vm2792_vm0, %v2791_v1 }
  0x9f   : > { %2594 = vmatprep.mubr.msk.bf16.mxu1 %vm2792_vm0, %v2791_v1 }
  0xa5   : > { %2559 = vmatmul.mubr.bf16.vlgmr.msra.gmra.mxu0 %v1248_v22 }
  0xa6   : > { %2595 = vmatmul.mubr.bf16.vlgmr.msra.gmra.mxu1 %v1411_v23  ;;  %2615 = vmatpush3.bf16.msra.mxu0 %v2759_v24 }
  0xa7   : > { %2616 = vmatprep.subr.bf16.mxu0 %v2791_v1  ;;  %2562 = vmatprep.mubr.msk.bf16.mxu0 %vm2792_vm0, %v2791_v1 }
  0xa8   : > { %2598 = vmatprep.mubr.msk.bf16.mxu1 %vm2792_vm0, %v2791_v1  ;;  %2658 = vmatpush3.bf16.msra.mxu1 %v2759_v24 }
  0xa9   : > { %2651 = vmatprep.subr.bf16.mxu1 %v2791_v1 }
  0xaa   : > { %2617 = vmatpush3.bf16.msra.mxu0 %v2760_v25 }
  0xab   : > { %2618 = vmatprep.subr.bf16.mxu0 %v2791_v1 }
  0xac   : > { %2659 = vmatpush3.bf16.msra.mxu1 %v2760_v25 }
  0xad   : > { %2563 = vmatmul.mubr.bf16.gmra.mxu0 %v1249_v28  ;;  %2652 = vmatprep.subr.bf16.mxu1 %v2791_v1 }
  0xae   : > { %2599 = vmatmul.mubr.bf16.gmra.mxu1 %v1412_v29  ;;  %2619 = vmatpush3.bf16.msra.mxu0 %v2761_v30 }
  0xaf   : > { %2566 = vmatprep.mubr.msk.bf16.mxu0 %vm2792_vm0, %v2791_v1  ;;  %2602 = vmatprep.mubr.msk.bf16.mxu1 %vm2792_vm0, %v2791_v1 }
  0xb0   : > { %2620 = vmatprep.subr.bf16.mxu0 %v2791_v1  ;;  %2660 = vmatpush3.bf16.msra.mxu1 %v2761_v30 }
  0xb1   : > { %2653 = vmatprep.subr.bf16.mxu1 %v2791_v1 }
  0xb2   : > { %2621 = vmatpush3.bf16.msra.mxu0 %v2762_v31 }
  0xb3   : > { %2622 = vmatprep.subr.bf16.mxu0 %v2791_v1 }
  0xb4   : > { %2661 = vmatpush3.bf16.msra.mxu1 %v2762_v31 }
  0xb5   : > { %2567 = vmatmul.mubr.bf16.gmra.mxu0 %v1250_v34  ;;  %2654 = vmatprep.subr.bf16.mxu1 %v2791_v1 }
  0xb6   : > { %2603 = vmatmul.mubr.bf16.gmra.mxu1 %v1413_v35  ;;  %2623 = vmatpush3.bf16.msra.mxu0 %v2763_v36 }
  0xb7   : > { %2570 = vmatprep.mubr.msk.bf16.mxu0 %vm2792_vm0, %v2791_v1  ;;  %2606 = vmatprep.mubr.msk.bf16.mxu1 %vm2792_vm0, %v2791_v1 }
  0xb8   : > { %2662 = vmatpush3.bf16.msra.mxu1 %v2763_v36  ;;  %2624 = vmatprep.subr.bf16.mxu0 %v2791_v1 }
  0xb9   : > { %2655 = vmatprep.subr.bf16.mxu1 %v2791_v1 }
  0xba   : > { %2625 = vmatpush3.bf16.msra.mxu0 %v2764_v37 }
  0xbb   : > { %2626 = vmatprep.subr.bf16.mxu0 %v2791_v1 }
  0xbc   : > { %2663 = vmatpush3.bf16.msra.mxu1 %v2764_v37 }
  0xbd   : > { %2571 = vmatmul.mubr.bf16.gmra.mxu0 %v1251_v40  ;;  %2656 = vmatprep.subr.bf16.mxu1 %v2791_v1 }
  0xbe   : > { %2607 = vmatmul.mubr.bf16.gmra.mxu1 %v1414_v41  ;;  %2574 = vmatprep.mubr.msk.bf16.mxu0 %vm2792_vm0, %v2791_v1 }
  0xbf   : > { %2610 = vmatprep.mubr.msk.bf16.mxu1 %vm2792_vm0, %v2791_v1  ;;  %2627 = vmatpush3.bf16.msra.mxu0 %v2765_v42 }
  0xc0   : > { %2664 = vmatpush3.bf16.msra.mxu1 %v2765_v42  ;;  %2628 = vmatprep.subr.bf16.mxu0 %v2791_v1 }
  0xc1   : > { %2657 = vmatprep.subr.bf16.mxu1 %v2791_v1 }
  0xc3   : > { %2629 = vmatpush3.bf16.msra.mxu0 %v2766_v46 }
  0xc4   : > { %2665 = vmatpush3.bf16.msra.mxu1 %v2766_v46 }
  0xc5   : > { %2575 = vmatmul.mubr.bf16.gmra.mxu0 %v1252_v47 }
  0xc6   : > { %2611 = vmatmul.mubr.bf16.gmra.mxu1 %v1415_v48  ;;  %2630 = vmatprep.mubr.msk.bf16.mxu0 %vm2792_vm0, %v2791_v1 }
  0xc7   : > { %2642 = vmatprep.mubr.msk.bf16.mxu1 %vm2792_vm0, %v2791_v1 }
  0xcd   : > { %2631 = vmatmul.mubr.bf16.vlgmr.msra.gmra.mxu0 %v1574_v53 }
  0xce   : > { %2643 = vmatmul.mubr.bf16.vlgmr.msra.gmra.mxu1 %v1577_v54  ;;  %2634 = vmatprep.mubr.msk.bf16.mxu0 %vm2792_vm0, %v2791_v1 }
  0xcf   : > { %2646 = vmatprep.mubr.msk.bf16.mxu1 %vm2792_vm0, %v2791_v1 }
  0xd5   : > { %2635 = vmatmul.mubr.bf16.gmra.mxu0 %v1575_v59 }
  0xd6   : > { %2647 = vmatmul.mubr.bf16.gmra.mxu1 %v1578_v60  ;;  %2638 = vmatprep.mubr.msk.bf16.mxu0 %vm2792_vm0, %v2791_v1 }
  0xdd   : > { %2639 = vmatmul.mubr.bf16.gmra.mxu0 %v1576_v63 }
  0xed   : > { %v426_v0 = vpop.f32.mrf.mxu0 }
  0xee   : > { %v547_v2 = vpop.f32.mrf.mxu1 }
  0xef   : > { %v548_v3 = vadd.f32 %v547_v2, %v426_v0  ;;  %v2344_v4 = vpop.f32.mrf.mxu0 }
  0xf0   : > { %v2380_v5 = vpop.f32.mrf.mxu1 }
  0xf1   : > { %v429_v6 = vpop.f32.mrf.mxu0 }
  0xf2   : > { %v550_v7 = vpop.f32.mrf.mxu1 }
  0xf3   : > { %v551_v8 = vadd.f32 %v550_v7, %v429_v6  ;;  %v2345_v9 = vpop.f32.mrf.mxu0 }
  0xf4   : > { %v2381_v10 = vpop.f32.mrf.mxu1 }
  0xf5   : > { %v434_v11 = vpop.f32.mrf.mxu0 }
  0xf6   : > { %v555_v12 = vpop.f32.mrf.mxu1 }
  0xf7   : > { %v556_v13 = vadd.f32 %v555_v12, %v434_v11  ;;  %v2348_v14 = vpop.f32.mrf.mxu0 }
  0xf8   : > { %v2384_v15 = vpop.f32.mrf.mxu1 }
  0xf9   : > { %v437_v1 = vpop.f32.mrf.mxu0 }
  0xfa   : > { %v558_v16 = vpop.f32.mrf.mxu1 }
  0xfb   : > { %v559_v17 = vadd.f32 %v558_v16, %v437_v1  ;;  %v2349_v18 = vpop.f32.mrf.mxu0 }
  0xfc   : > { %v2385_v19 = vpop.f32.mrf.mxu1 }
  0xfd   : > { %v442_v20 = vpop.f32.mrf.mxu0 }
  0xfe   : > { %v563_v21 = vpop.f32.mrf.mxu1 }
  0xff   : > { %v564_v22 = vadd.f32 %v563_v21, %v442_v20  ;;  %v2352_v23 = vpop.f32.mrf.mxu0 }
 0x100   : > { %v2388_v24 = vpop.f32.mrf.mxu1 }
 0x101   : > { %v445_v25 = vpop.f32.mrf.mxu0 }
 0x102   : > { %v566_v26 = vpop.f32.mrf.mxu1 }
 0x103   : > { %v567_v27 = vadd.f32 %v566_v26, %v445_v25  ;;  %v2353_v28 = vpop.f32.mrf.mxu0 }
 0x104   : > { %v2389_v29 = vpop.f32.mrf.mxu1 }
 0x105   : > { %v450_v30 = vpop.f32.mrf.mxu0 }
 0x106   : > { %v571_v31 = vpop.f32.mrf.mxu1 }
 0x107   : > { %v572_v32 = vadd.f32 %v571_v31, %v450_v30  ;;  %v2356_v33 = vpop.f32.mrf.mxu0 }
 0x108   : > { %v2392_v34 = vpop.f32.mrf.mxu1 }
 0x109   : > { %v453_v35 = vpop.f32.mrf.mxu0 }
 0x10a   : > { %v574_v36 = vpop.f32.mrf.mxu1 }
 0x10b   : > { %v575_v37 = vadd.f32 %v574_v36, %v453_v35  ;;  %v2357_v38 = vpop.f32.mrf.mxu0 }
 0x10c   : > { %v2393_v39 = vpop.f32.mrf.mxu1 }
 0x10d   : > { %v458_v40 = vpop.f32.mrf.mxu0 }
 0x10e   : > { %v579_v41 = vpop.f32.mrf.mxu1 }
 0x10f   : > { %v580_v42 = vadd.f32 %v579_v41, %v458_v40  ;;  %v2360_v43 = vpop.f32.mrf.mxu0 }
 0x110   : > { %v2396_v44 = vpop.f32.mrf.mxu1 }
 0x111   : > { %v461_v45 = vpop.f32.mrf.mxu0 }
 0x112   : > { %v582_v46 = vpop.f32.mrf.mxu1 }
 0x113   : > { %v583_v47 = vadd.f32 %v582_v46, %v461_v45  ;;  %v2361_v48 = vpop.f32.mrf.mxu0 }
 0x114   : > { %v2397_v49 = vpop.f32.mrf.mxu1 }
 0x115   : > { %v700_v50 = vpop.f32.mrf.mxu0 }
 0x116   : > { %v739_v51 = vadd.f32 %v700_v50, %v548_v3  ;;  %v863_v52 = vpop.f32.mrf.mxu1 }
 0x117   : > { %v2416_v53 = vpop.f32.mrf.mxu0 }
 0x118   : > { %v902_v54 = vadd.f32 %v863_v52, %v739_v51  ;;  %v2452_v55 = vpop.f32.mrf.mxu1 }
 0x119   : > { %v703_v56 = vpop.f32.mrf.mxu0 }
 0x11a   : > { %v740_v57 = vadd.f32 %v703_v56, %v551_v8  ;;  %v866_v58 = vpop.f32.mrf.mxu1 }
 0x11b   : > { %v2417_v59 = vpop.f32.mrf.mxu0 }
 0x11c   : > { %v903_v60 = vadd.f32 %v866_v58, %v740_v57  ;;  %v2453_v61 = vpop.f32.mrf.mxu1 }
 0x11d   : > { %v708_v62 = vpop.f32.mrf.mxu0 }
 0x11e   : > { %v741_v63 = vadd.f32 %v708_v62, %v556_v13  ;;  %v871_v0 = vpop.f32.mrf.mxu1 }
 0x11f   : > { %v2420_v2 = vpop.f32.mrf.mxu0 }
 0x120   : > { %v904_v4 = vadd.f32 %v871_v0, %v741_v63  ;;  %v2456_v5 = vpop.f32.mrf.mxu1 }
 0x121   : > { %v711_v6 = vpop.f32.mrf.mxu0 }
 0x122   : > { %v742_v7 = vadd.f32 %v711_v6, %v559_v17  ;;  %v874_v9 = vpop.f32.mrf.mxu1 }
 0x123   : > { %v2421_v3 = vpop.f32.mrf.mxu0 }
 0x124   : > { %v905_v10 = vadd.f32 %v874_v9, %v742_v7  ;;  %v2457_v11 = vpop.f32.mrf.mxu1 }
 0x125   : > { %v716_v12 = vpop.f32.mrf.mxu0 }
 0x126   : > { %v743_v14 = vadd.f32 %v716_v12, %v564_v22  ;;  %v879_v15 = vpop.f32.mrf.mxu1 }
 0x127   : > { %v2424_v8 = vpop.f32.mrf.mxu0 }
 0x128   : > { %v906_v1 = vadd.f32 %v879_v15, %v743_v14  ;;  %v2460_v16 = vpop.f32.mrf.mxu1 }
 0x129   : > { %v719_v18 = vpop.f32.mrf.mxu0 }
 0x12a   : > { %v744_v19 = vadd.f32 %v719_v18, %v567_v27  ;;  %v882_v20 = vpop.f32.mrf.mxu1 }
 0x12b   : > { %v2425_v13 = vpop.f32.mrf.mxu0 }
 0x12c   : > { %v907_v21 = vadd.f32 %v882_v20, %v744_v19  ;;  %v2461_v23 = vpop.f32.mrf.mxu1 }
 0x12d   : > { %v724_v24 = vpop.f32.mrf.mxu0 }
 0x12e   : > { %v745_v25 = vadd.f32 %v724_v24, %v572_v32  ;;  %v887_v26 = vpop.f32.mrf.mxu1 }
 0x12f   : > { %v2428_v17 = vpop.f32.mrf.mxu0 }
 0x130   : > { %v3342_v28 = vadd.f32 %v887_v26, %v745_v25  ;;  %v2464_v29 = vpop.f32.mrf.mxu1 }
 0x131   : > { %v727_v30 = vpop.f32.mrf.mxu0 }
 0x132   : > { %v746_v31 = vadd.f32 %v727_v30, %v575_v37  ;;  %v890_v22 = vpop.f32.mrf.mxu1 }
 0x133   : > { %v2429_v33 = vpop.f32.mrf.mxu0 }
 0x134   : > { %v3344_v34 = vadd.f32 %v890_v22, %v746_v31  ;;  %v2465_v35 = vpop.f32.mrf.mxu1 }
 0x135   : > { %v732_v36 = vpop.f32.mrf.mxu0 }
 0x136   : > { %v747_v27 = vadd.f32 %v732_v36, %v580_v42  ;;  %v895_v38 = vpop.f32.mrf.mxu1 }
 0x137   : > { %v2432_v39 = vpop.f32.mrf.mxu0 }
 0x138   : > { %v3346_v40 = vadd.f32 %v895_v38, %v747_v27  ;;  %v2468_v41 = vpop.f32.mrf.mxu1 }
 0x139   : > { %v735_v32 = vpop.f32.mrf.mxu0 }
 0x13a   : > { %v748_v43 = vadd.f32 %v735_v32, %v583_v47  ;;  %v898_v44 = vpop.f32.mrf.mxu1 }
 0x13b   : > { %v2433_v45 = vpop.f32.mrf.mxu0 }
 0x13c   : > { %v3348_v46 = vadd.f32 %v898_v44, %v748_v43  ;;  %v2469_v48 = vpop.f32.mrf.mxu1 }
 0x13d   : > { %v1026_v37 = vpop.f32.mrf.mxu0 }
 0x13e   : > { %v1065_v49 = vadd.f32 %v1026_v37, %v902_v54  ;;  %v1189_v50 = vpop.f32.mrf.mxu1 }
 0x13f   : > { %v2488_v51 = vpop.f32.mrf.mxu0 }
 0x140   : > { %v3350_v52 = vadd.f32 %v1189_v50, %v1065_v49  ;;  %v2524_v53 = vpop.f32.mrf.mxu1 }
 0x141   : > { %v1029_v42 = vpop.f32.mrf.mxu0 }
 0x142   : > { %v1066_v55 = vadd.f32 %v1029_v42, %v903_v60  ;;  %v1192_v56 = vpop.f32.mrf.mxu1 }
 0x143   : > { %v2489_v57 = vpop.f32.mrf.mxu0 }
 0x144   : > { %v3352_v58 = vadd.f32 %v1192_v56, %v1066_v55  ;;  %v2525_v59 = vpop.f32.mrf.mxu1 }
 0x145   : > { %v1034_v47 = vpop.f32.mrf.mxu0 }
 0x146   : > { %v1067_v61 = vadd.f32 %v1034_v47, %v904_v4  ;;  %v1197_v62 = vpop.f32.mrf.mxu1 }
 0x147   : > { %v2492_v63 = vpop.f32.mrf.mxu0 }
 0x148   : > { %v3354_v0 = vadd.f32 %v1197_v62, %v1067_v61  ;;  %v2528_v2 = vpop.f32.mrf.mxu1 }
 0x149   : > { %v1037_v54 = vpop.f32.mrf.mxu0 }
 0x14a   : > { %v1068_v5 = vadd.f32 %v1037_v54, %v905_v10  ;;  %v1200_v6 = vpop.f32.mrf.mxu1 }
 0x14b   : > { %v2493_v7 = vpop.f32.mrf.mxu0 }
 0x14c   : > { %v3356_v9 = vadd.f32 %v1200_v6, %v1068_v5  ;;  %v2529_v3 = vpop.f32.mrf.mxu1 }
 0x14d   : > { %v1042_v60 = vpop.f32.mrf.mxu0 }
 0x14e   : > { %v1069_v11 = vadd.f32 %v1042_v60, %v906_v1  ;;  %v1205_v12 = vpop.f32.mrf.mxu1 }
 0x14f   : > { %v2496_v14 = vpop.f32.mrf.mxu0 }
 0x150   : > { %v3358_v15 = vadd.f32 %v1205_v12, %v1069_v11  ;;  %v2532_v8 = vpop.f32.mrf.mxu1 }
 0x151   : > { %v1045_v4 = vpop.f32.mrf.mxu0 }
 0x152   : > { %v1070_v16 = vadd.f32 %v1045_v4, %v907_v21  ;;  %v1208_v18 = vpop.f32.mrf.mxu1 }
 0x153   : > { %v2497_v19 = vpop.f32.mrf.mxu0 }
 0x154   : > { %v3360_v20 = vadd.f32 %v1208_v18, %v1070_v16  ;;  %v2533_v13 = vpop.f32.mrf.mxu1 }
 0x155   : > { %v1050_v10 = vpop.f32.mrf.mxu0 }
 0x156   : > { %v1213_v23 = vpop.f32.mrf.mxu1  ;;  %v1071_v12 = vadd.f32 %v1050_v10, %v3342_v28 }
 0x157   : > { %v2500_v24 = vpop.f32.mrf.mxu0 }
 0x158   : > { %v2536_v25 = vpop.f32.mrf.mxu1  ;;  %v1234_v18 = vadd.f32 %v1213_v23, %v1071_v12 }
 0x159   : > { %v1053_v26 = vpop.f32.mrf.mxu0 }
 0x15a   : > { %v1216_v17 = vpop.f32.mrf.mxu1  ;;  %v1072_v19 = vadd.f32 %v1053_v26, %v3344_v34  ;;  %v3387_v34 = vld [vmem:[%s3449_s2] ss:$0 sm:$0xff] }
 0x15b   : > { %v2501_v29 = vpop.f32.mrf.mxu0 }
 0x15c   : > { %v2537_v1 = vpop.f32.mrf.mxu1 }
 0x15d   : > { %v1058_v30 = vpop.f32.mrf.mxu0 }
 0x15e   : > { %v3362_v31 = vpop.f32.mrf.mxu1 }
 0x15f   : > { %v2504_v22 = vpop.f32.mrf.mxu0 }
 0x160   : > { %v2540_v33 = vpop.f32.mrf.mxu1 }
 0x161   : > { %v1061_v35 = vpop.f32.mrf.mxu0  ;;  %v1235_v33 = vadd.f32 %v1216_v17, %v1072_v19 }
 0x162   : > { %v3364_v21 = vpop.f32.mrf.mxu1  ;;  %v1074_v26 = vadd.f32 %v1061_v35, %v3348_v46 }
 0x163   : > { %v2505_v36 = vpop.f32.mrf.mxu0 }
 0x164   : > { %v2541_v27 = vpop.f32.mrf.mxu1  ;;  %v1073_v36 = vadd.f32 %v1058_v30, %v3346_v40  ;;  %v1237_v35 = vadd.f32 %v3364_v21, %v1074_v26 }
 0x165   : > { %v1352_v38 = vpop.f32.mrf.mxu0 }
 0x166   : > { %v1515_v39 = vpop.f32.mrf.mxu1  ;;  %v1391_v24 = vadd.f32 %v1352_v38, %v3350_v52 }
 0x167   : > { %v2560_v41 = vpop.f32.mrf.mxu0 }
 0x168   : > { %v2596_v32 = vpop.f32.mrf.mxu1  ;;  %v1554_v28 = vadd.f32 %v1515_v39, %v1391_v24 }
 0x169   : > { %v1355_v43 = vpop.f32.mrf.mxu0 }
 0x16a   : > { %v1518_v44 = vpop.f32.mrf.mxu1  ;;  %v1392_v10 = vadd.f32 %v1355_v43, %v3352_v58  ;;  %v1236_v58 = vadd.f32 %v3362_v31, %v1073_v36  ;;  %v1746_v36 = vld [vmem:[%s3392_s22 + $0x10] sm:$0xff] }
 0x16b   : > { %v2561_v45 = vpop.f32.mrf.mxu0 }
 0x16c   : > { %v2597_v48 = vpop.f32.mrf.mxu1  ;;  %v1555_v38 = vadd.f32 %v1518_v44, %v1392_v10 }
 0x16d   : > { %v1360_v37 = vpop.f32.mrf.mxu0 }
 0x16e   : > { %v3366_v49 = vpop.f32.mrf.mxu1  ;;  %v1393_v39 = vadd.f32 %v1360_v37, %v3354_v0 }
 0x16f   : > { %v2564_v50 = vpop.f32.mrf.mxu0 }
 0x170   : > { %v2600_v51 = vpop.f32.mrf.mxu1 }
 0x171   : > { %v1363_v53 = vpop.f32.mrf.mxu0 }
 0x172   : > { %v3368_v42 = vpop.f32.mrf.mxu1  ;;  %v1394_v44 = vadd.f32 %v1363_v53, %v3356_v9 }
 0x173   : > { %v2565_v55 = vpop.f32.mrf.mxu0 }
 0x174   : > { %v2601_v56 = vpop.f32.mrf.mxu1  ;;  %v1744_v55 = vld [vmem:[%s3392_s22] sm:$0xff] }
 0x175   : > { %v3370_v57 = vpop.f32.mrf.mxu0 }
 0x176   : > { %v3372_v59 = vpop.f32.mrf.mxu1 }
 0x177   : > { %v2568_v47 = vpop.f32.mrf.mxu0 }
 0x178   : > { %v2604_v61 = vpop.f32.mrf.mxu1 }
 0x179   : > { %v3374_v62 = vpop.f32.mrf.mxu0  ;;  %v1750_v61 = vld [vmem:[%s3392_s22 + $0x30] sm:$0xff] }
 0x17a   : > { %v3376_v63 = vpop.f32.mrf.mxu1 }
 0x17b   : > { %v2569_v2 = vpop.f32.mrf.mxu0 }
 0x17c   : > { %v2605_v54 = vpop.f32.mrf.mxu1  ;;  %v1745_v2 = vld [vmem:[%s3392_s22 + $0x8] sm:$0xff] }
 0x17d   : > { %v1376_v5 = vpop.f32.mrf.mxu0  ;;  %v1556_v54 = vadd.f32 %v3366_v49, %v1393_v39 }
 0x17e   : > { %v1539_v6 = vpop.f32.mrf.mxu1  ;;  %v1397_v29 = vadd.f32 %v1376_v5, %v1234_v18 }
 0x17f   : > { %v2572_v7 = vpop.f32.mrf.mxu0 }
 0x180   : > { %v2608_v3 = vpop.f32.mrf.mxu1  ;;  %v1560_v32 = vadd.f32 %v1539_v6, %v1397_v29  ;;  %v1751_v7 = vld [vmem:[%s3392_s22 + $0x38] sm:$0xff] }
 0x181   : > { %v1379_v60 = vpop.f32.mrf.mxu0 }
 0x182   : > { %v1542_v11 = vpop.f32.mrf.mxu1  ;;  %v1398_v23 = vadd.f32 %v1379_v60, %v1235_v33 }
 0x183   : > { %v2573_v14 = vpop.f32.mrf.mxu0 }
 0x184   : > { %v2609_v8 = vpop.f32.mrf.mxu1  ;;  %v1561_v50 = vadd.f32 %v1542_v11, %v1398_v23 }
 0x185   : > { %v1384_v4 = vpop.f32.mrf.mxu0 }
 0x186   : > { %v1547_v16 = vpop.f32.mrf.mxu1  ;;  %v1399_v51 = vadd.f32 %v1384_v4, %v1236_v58  ;;  %v1557_v4 = vadd.f32 %v3368_v42, %v1394_v44 }
 0x187   : > { %v2576_v13 = vpop.f32.mrf.mxu0 }
 0x188   : > { %v2612_v25 = vpop.f32.mrf.mxu1  ;;  %v1562_v60 = vadd.f32 %v1547_v16, %v1399_v51  ;;  %v1395_v13 = vadd.f32 %v3370_v57, %v3358_v15 }
 0x189   : > { %v1387_v1 = vpop.f32.mrf.mxu0 }
 0x18a   : > { %v1550_v22 = vpop.f32.mrf.mxu1  ;;  %v1400_v11 = vadd.f32 %v1387_v1, %v1237_v35 }
 0x18b   : > { %v2577_v27 = vpop.f32.mrf.mxu0 }
 0x18c   : > { %v2613_v41 = vpop.f32.mrf.mxu1  ;;  %v1563_v1 = vadd.f32 %v1550_v22, %v1400_v11  ;;  %v1747_v22 = vld [vmem:[%s3392_s22 + $0x18] sm:$0xff] }
 0x18d   : > { %v1678_v45 = vpop.f32.mrf.mxu0 }
 0x18e   : > { %v1717_v40 = vadd.f32 %v1678_v45, %v1554_v28  ;;  %v1702_v52 = vpop.f32.mrf.mxu1  ;;  %v1752_v28 = vld [vmem:[%s3392_s22 + $0x40] sm:$0xff] }
 0x18f   : > { %v1723_v17 = vadd.f32 %v1702_v52, %v1560_v32  ;;  %v2632_v30 = vpop.f32.mrf.mxu0  ;;  %v1396_v52 = vadd.f32 %v3374_v62, %v3360_v20 }
 0x190   : > { %v1734_v43 = vadd.f32 %v3387_v34, %v1717_v40  ;;  %v2644_v48 = vpop.f32.mrf.mxu1  ;;  %v1558_v40 = vadd.f32 %v3372_v59, %v1395_v13 }
 0x191   : > { %v1740_v56 = vadd.f32 %v3387_v34, %v1723_v17  ;;  %v1681_v47 = vpop.f32.mrf.mxu0  ;;  %v1753_v17 = vld [vmem:[%s3392_s22 + $0x48] sm:$0xff]  ;;  %v1559_v20 = vadd.f32 %v3376_v63, %v1396_v52 }
 0x192   : > { %v1718_v31 = vadd.f32 %v1681_v47, %v1555_v38  ;;  %v1705_v46 = vpop.f32.mrf.mxu1  ;;  %v1754_v5 = vadd.f32 %v1744_v55, %v1734_v43 }
 0x193   : > { %v1724_v0 = vadd.f32 %v1705_v46, %v1561_v50  ;;  %v2633_v37 = vpop.f32.mrf.mxu0  ;;  %v1760_v12 = vadd.f32 %v1750_v61, %v1740_v56 }
 0x194   : > { %v1735_v6 = vadd.f32 %v3387_v34, %v1718_v31  ;;  %v2645_v3 = vpop.f32.mrf.mxu1  ;;  %v1764_v16 = vmax.f32 %v1754_v5, 0.0  ;;  %v1748_v31 = vld [vmem:[%s3392_s22 + $0x20] sm:$0xff] }
 0x195   : > { %v1741_v14 = vadd.f32 %v3387_v34, %v1724_v0  ;;  %v1686_v8 = vpop.f32.mrf.mxu0  ;;  %v1770_v33 = vmax.f32 %v1760_v12, 0.0  ;;  %v1749_v0 = vld [vmem:[%s3392_s22 + $0x28] sm:$0xff] }
 0x196   : > { %v1755_v21 = vadd.f32 %v1745_v2, %v1735_v6  ;;  %v1719_v9 = vadd.f32 %v1686_v8, %v1556_v54  ;;  %v1710_v53 = vpop.f32.mrf.mxu1 }
 0x197   : > { %v1761_v18 = vadd.f32 %v1751_v7, %v1741_v14  ;;  %v1725_v49 = vadd.f32 %v1710_v53, %v1562_v60  ;;  %v2636_v19 = vpop.f32.mrf.mxu0 }
 0x198   : > { %v1765_v24 = vmax.f32 %v1755_v21, 0.0  ;;  %v1736_v25 = vadd.f32 %v3387_v34, %v1719_v9  ;;  %v2648_v29 = vpop.f32.mrf.mxu1 }
 0x199   : > { %v1771_v42 = vmax.f32 %v1761_v18, 0.0  ;;  %v1742_v27 = vadd.f32 %v3387_v34, %v1725_v49  ;;  %v1689_v15 = vpop.f32.mrf.mxu0 }
 0x19a   : > { %v2183_v57 = vpack.c.bf16 %v1765_v24, %v1764_v16  ;;  %v1720_v10 = vadd.f32 %v1689_v15, %v1557_v4  ;;  %v1713_v41 = vpop.f32.mrf.mxu1  ;;  %v1756_v58 = vadd.f32 %v1746_v36, %v1736_v25 }
 0x19b   : > { %v2198_v32 = vpack.c.bf16 %v1771_v42, %v1770_v33  ;;  %v1726_v23 = vadd.f32 %v1713_v41, %v1563_v1  ;;  %v2637_v45 = vpop.f32.mrf.mxu0  ;;  %v1762_v38 = vadd.f32 %v1752_v28, %v1742_v27 }
 0x19c   : > { %2184 = vst [vmem:[%s3416_s26] sm:$0xff] %v2183_v57   ;;  %v1737_v26 = vadd.f32 %v3387_v34, %v1720_v10  ;;  %v2649_v30 = vpop.f32.mrf.mxu1  ;;  %v1766_v62 = vmax.f32 %v1756_v58, 0.0 }
 0x19d   : > { %2207 = vst [vmem:[%s3416_s26 + $0x18] sm:$0xff] %v2198_v32   ;;  %v1743_v39 = vadd.f32 %v3387_v34, %v1726_v23  ;;  %v1694_v43 = vpop.f32.mrf.mxu0  ;;  %v1772_v47 = vmax.f32 %v1762_v38, 0.0 }
 0x19e   : > { %v1757_v48 = vadd.f32 %v1747_v22, %v1737_v26  ;;  %v1721_v50 = vadd.f32 %v1694_v43, %v1558_v40 }
 0x19f   : > { %v1763_v59 = vadd.f32 %v1753_v17, %v1743_v39  ;;  %v2640_v51 = vpop.f32.mrf.mxu0 }
 0x1a0   : > { %v1767_v55 = vmax.f32 %v1757_v48, 0.0  ;;  %v1738_v56 = vadd.f32 %v3387_v34, %v1721_v50 }
 0x1a1   : > { %v1773_v61 = vmax.f32 %v1763_v59, 0.0  ;;  %v1697_v46 = vpop.f32.mrf.mxu0 }
 0x1a2   : > { %v2188_v35 = vpack.c.bf16 %v1767_v55, %v1766_v62  ;;  %v1722_v44 = vadd.f32 %v1697_v46, %v1559_v20  ;;  %v1758_v54 = vadd.f32 %v1748_v31, %v1738_v56 }
 0x1a3   : > { %v2203_v2 = vpack.c.bf16 %v1773_v61, %v1772_v47  ;;  %v2641_v37 = vpop.f32.mrf.mxu0 }
 0x1a4   : > { %2205 = vst [vmem:[%s3416_s26 + $0x8] sm:$0xff] %v2188_v35   ;;  %v1739_v5 = vadd.f32 %v3387_v34, %v1722_v44  ;;  %v1768_v6 = vmax.f32 %v1758_v54, 0.0 }
 0x1a5   : > { %2208 = vst [vmem:[%s3416_s26 + $0x20] sm:$0xff] %v2203_v2  }
 0x1a6   : > { %v1759_v63 = vadd.f32 %v1749_v0, %v1739_v5 }
 0x1a8   : > { %v1769_v7 = vmax.f32 %v1759_v63, 0.0 }
 0x1aa   : > { %v2193_v3 = vpack.c.bf16 %v1769_v7, %v1768_v6 }
 0x1ac   : > { %2206 = vst [vmem:[%s3416_s26 + $0x10] sm:$0xff] %v2193_v3  }
 0x1ad PF: > { %s14_s17 = sadd.s32 1, %s2789_s17   ;;  %s3452_s15 = smov %s2785_s16 }
 0x1ae   : > { %p11_p5 = scmp.ge.s32.totalorder %s14_s17, 4   ;;  %s3453_s16 = smov %s3455_s18 }
 0x1b0   :  { %13 = sbr.rel (!%p11_p5) target bundleno = 2 (0x2), region = 83 }

</bundles_post_ra>
